<compile_context>
chip_gen: v6e
topology: v6e:2x2x1
jax: 0.10.0
libtpu: 0.0.40
codegen_flags: <defaults>
</compile_context>

<pallas_src>
import math

import jax
import jax.numpy as jnp
from jax.experimental import pallas as pl
from jax.experimental.pallas import tpu as pltpu


# ---------------------------------------------------------------------------
# In-kernel helpers (operate on VMEM-resident values; accumulation in f32).
# ---------------------------------------------------------------------------

def _layer_norm(x, gamma, beta, eps):
    mu = jnp.mean(x, axis=-1, keepdims=True)
    xc = x - mu
    var = jnp.mean(xc * xc, axis=-1, keepdims=True)
    return xc * jax.lax.rsqrt(var + eps) * gamma + beta


def _split_heads(x2d, bt, s, nhead, hd):
    """(bt*s, nhead*hd) batch-major rows -> (nhead*bt, s, hd) batched-head layout.

    Built from leading-dim reshapes, static minor-dim slices and a leading-dim
    concat only (all known-good Mosaic lowerings).  Prefer s % 8 == 0.
    """
    x3 = x2d.reshape(bt, s, nhead * hd)
    return jnp.concatenate(
        [x3[:, :, h * hd:(h + 1) * hd] for h in range(nhead)], axis=0)


def _merge_heads(ctx, bt, s, nhead, hd):
    """(nhead*bt, s, hd) -> (bt*s, nhead*hd)."""
    cols = [ctx[h * bt:(h + 1) * bt].reshape(bt * s, hd) for h in range(nhead)]
    return jnp.concatenate(cols, axis=-1)


def _mha(q_in, k_in, v_in, *, bt, sq, sk, nhead, w_q, b_q, w_k, b_k, w_v, b_v,
         w_o, b_o, mask, mm_dtype):
    """Multi-head attention on batch-major flattened token slabs.

    q_in: (bt*sq, D), k_in/v_in: (bt*sk, D).  1/sqrt(hd) is pre-folded into w_q/b_q.
    mask: (sq, sk) additive float mask or None.  Heads are batched into one 3D einsum.
    """
    d = q_in.shape[-1]
    hd = d // nhead
    f32 = jnp.float32

    # Big-M projections (whole batch block of tokens at once).
    q = jnp.dot(q_in.astype(mm_dtype), w_q, preferred_element_type=f32) + b_q
    k = jnp.dot(k_in.astype(mm_dtype), w_k, preferred_element_type=f32) + b_k
    v = jnp.dot(v_in.astype(mm_dtype), w_v, preferred_element_type=f32) + b_v

    qh = _split_heads(q, bt, sq, nhead, hd)      # (nhead*bt, sq, hd)
    kh = _split_heads(k, bt, sk, nhead, hd)      # (nhead*bt, sk, hd)
    vh = _split_heads(v, bt, sk, nhead, hd)

    s = jnp.einsum('bqc,bkc->bqk', qh.astype(mm_dtype), kh.astype(mm_dtype),
                   preferred_element_type=f32)   # (nhead*bt, sq, sk)
    if mask is not None:                         # static specialization
        s = s + mask                             # (sq, sk) broadcasts over batch*heads
    s = s - jnp.max(s, axis=-1, keepdims=True)
    p = jnp.exp(s)
    p = p * pl.reciprocal(jnp.sum(p, axis=-1, keepdims=True), approx=True)

    ctx = jnp.einsum('bqk,bkc->bqc', p.astype(mm_dtype), vh.astype(mm_dtype),
                     preferred_element_type=f32)  # (nhead*bt, sq, hd)
    ctx2d = _merge_heads(ctx, bt, sq, nhead, hd)  # (bt*sq, D)
    return jnp.dot(ctx2d.astype(mm_dtype), w_o, preferred_element_type=f32) + b_o


def _make_decoder_layer_kernel(*, nhead, block_b, s_t, s_m,
                               has_qpos, has_mpos, has_smask, has_mmask, mm_dtype):
    f32 = jnp.float32

    def kernel(*refs):
        it = iter(refs)
        tgt_ref = next(it)
        mem_ref = next(it)
        qpos_ref = next(it) if has_qpos else None
        mpos_ref = next(it) if has_mpos else None
        smask_ref = next(it) if has_smask else None
        mmask_ref = next(it) if has_mmask else None
        (ln1_g, ln1_b,
         sa_wq, sa_bq, sa_wk, sa_bk, sa_wv, sa_bv, sa_wo, sa_bo,
         ln2_g, ln2_b,
         ca_wq, ca_bq, ca_wk, ca_bk, ca_wv, ca_bv, ca_wo, ca_bo,
         lnf_g, lnf_b, ff_w1, ff_b1, ff_w2, ff_b2,
         out_ref) = tuple(it)

        tgt = tgt_ref[...].astype(f32)            # (block_b*s_t, d)
        mem = mem_ref[...].astype(f32)            # (block_b*s_m, d)
        qpos = qpos_ref[...].astype(f32) if has_qpos else None
        smask = smask_ref[...] if has_smask else None
        mmask = mmask_ref[...] if has_mmask else None

        # ---- self-attention block (pre-norm); dropout1 == identity (eval) ----
        x1 = _layer_norm(tgt, ln1_g[...], ln1_b[...], 1e-5)
        qk = (x1 + qpos) if has_qpos else x1
        sa = _mha(qk, qk, x1, bt=block_b, sq=s_t, sk=s_t, nhead=nhead,
                  w_q=sa_wq[...], b_q=sa_bq[...], w_k=sa_wk[...], b_k=sa_bk[...],
                  w_v=sa_wv[...], b_v=sa_bv[...], w_o=sa_wo[...], b_o=sa_bo[...],
                  mask=smask, mm_dtype=mm_dtype)
        t1 = tgt + sa

        # ---- cross-attention block; dropout2 == identity (eval) ----
        x2 = _layer_norm(t1, ln2_g[...], ln2_b[...], 1e-5)
        q2 = (x2 + qpos) if has_qpos else x2
        kmem = (mem + mpos_ref[...].astype(f32)) if has_mpos else mem
        ca = _mha(q2, kmem, mem, bt=block_b, sq=s_t, sk=s_m, nhead=nhead,
                  w_q=ca_wq[...], b_q=ca_bq[...], w_k=ca_wk[...], b_k=ca_bk[...],
                  w_v=ca_wv[...], b_v=ca_bv[...], w_o=ca_wo[...], b_o=ca_bo[...],
                  mask=mmask, mm_dtype=mm_dtype)
        t2 = t1 + ca

        # ---- PositionwiseFeedForward: LN(eps=1e-6) -> Linear -> ReLU -> Linear, + residual
        xn = _layer_norm(t2, lnf_g[...], lnf_b[...], 1e-6)
        h = jnp.maximum(
            jnp.dot(xn.astype(mm_dtype), ff_w1[...], preferred_element_type=f32)
            + ff_b1[...], 0.0)
        y = jnp.dot(h.astype(mm_dtype), ff_w2[...], preferred_element_type=f32) + ff_b2[...]
        out_ref[...] = (t2 + y).astype(out_ref.dtype)

    return kernel


# ---------------------------------------------------------------------------
# pallas_call wrapper
# ---------------------------------------------------------------------------

def transformer_decoder_layer_forward(params, tgt, memory, *, nhead,
                                      attn_mask=None, memory_mask=None,
                                      pos=None, query_pos=None,
                                      block_b=8, matmul_dtype=jnp.float32):
    """tgt: (S_t, B, D), memory: (S_m, B, D) — PyTorch seq-first convention."""
    s_t, b, d = tgt.shape
    s_m = memory.shape[0]
    ff = params['ff_w1'].shape[1]
    hd = d // nhead
    f32 = jnp.float32

    # Batch block size: largest divisor of B not exceeding `block_b`.
    bb = max(1, min(block_b, b))
    while b % bb:
        bb -= 1
    grid = (b // bb,)

    # Batch-major flattened token slabs (one fused XLA transpose+reshape per tensor).
    def to_slab(x):
        return jnp.transpose(x, (1, 0, 2)).reshape(b * x.shape[0], d)

    has_qpos = query_pos is not None
    has_mpos = pos is not None
    has_smask = attn_mask is not None
    has_mmask = memory_mask is not None

    inputs = [to_slab(tgt), to_slab(memory)]
    in_specs = [pl.BlockSpec((bb * s_t, d), lambda i: (i, 0)),
                pl.BlockSpec((bb * s_m, d), lambda i: (i, 0))]
    if has_qpos:
        inputs.append(to_slab(query_pos.astype(f32)))
        in_specs.append(pl.BlockSpec((bb * s_t, d), lambda i: (i, 0)))
    if has_mpos:
        inputs.append(to_slab(pos.astype(f32)))
        in_specs.append(pl.BlockSpec((bb * s_m, d), lambda i: (i, 0)))
    if has_smask:
        inputs.append(attn_mask.astype(f32))
        in_specs.append(pl.BlockSpec((s_t, s_t), lambda i: (0, 0)))
    if has_mmask:
        inputs.append(memory_mask.astype(f32))
        in_specs.append(pl.BlockSpec((s_t, s_m), lambda i: (0, 0)))

    # Weights: fold 1/sqrt(hd) into the Q projections; store matmul weights in
    # matmul_dtype (bf16 halves weight DMA + VMEM residency on v6e/v7x).
    scale = 1.0 / math.sqrt(hd)
    wd = matmul_dtype
    weight_list = [
        params['ln1_g'], params['ln1_b'],
        (params['sa_wq'] * scale).astype(wd), params['sa_bq'] * scale,
        params['sa_wk'].astype(wd), params['sa_bk'],
        params['sa_wv'].astype(wd), params['sa_bv'],
        params['sa_wo'].astype(wd), params['sa_bo'],
        params['ln2_g'], params['ln2_b'],
        (params['ca_wq'] * scale).astype(wd), params['ca_bq'] * scale,
        params['ca_wk'].astype(wd), params['ca_bk'],
        params['ca_wv'].astype(wd), params['ca_bv'],
        params['ca_wo'].astype(wd), params['ca_bo'],
        params['lnf_g'], params['lnf_b'],
        params['ff_w1'].astype(wd), params['ff_b1'],
        params['ff_w2'].astype(wd), params['ff_b2'],
    ]

    def shared(x):
        shp = x.shape
        # Constant block index -> fetched once, VMEM-resident across all grid steps.
        return pl.BlockSpec(shp, lambda i, _n=len(shp): (0,) * _n)

    inputs += weight_list
    in_specs += [shared(w) for w in weight_list]

    kernel = _make_decoder_layer_kernel(
        nhead=nhead, block_b=bb, s_t=s_t, s_m=s_m,
        has_qpos=has_qpos, has_mpos=has_mpos,
        has_smask=has_smask, has_mmask=has_mmask, mm_dtype=wd)

    # Advisory cost estimate so XLA schedules the surrounding transposes sensibly.
    tok_t, tok_m = b * s_t, b * s_m
    flops = 2 * (6 * tok_t * d * d            # self q,k,v,out + cross q,out projections
                 + 2 * tok_m * d * d          # cross k,v projections
                 + 2 * b * s_t * s_t * d      # self scores + context
                 + 2 * b * s_t * s_m * d      # cross scores + context
                 + 2 * tok_t * d * ff)        # FFN
    act_bytes = 4 * (2 * tok_t * d + tok_m * d)
    act_bytes += 4 * tok_t * d if has_qpos else 0
    act_bytes += 4 * tok_m * d if has_mpos else 0
    act_bytes += 4 * s_t * s_t if has_smask else 0
    act_bytes += 4 * s_t * s_m if has_mmask else 0
    w_bytes = sum(int(x.size) * x.dtype.itemsize for x in weight_list)
    cost = pl.CostEstimate(flops=int(flops),
                           transcendentals=int(b * nhead * (s_t * s_t + s_t * s_m)),
                           bytes_accessed=int(act_bytes + w_bytes))

    out_slab = pl.pallas_call(
        kernel,
        out_shape=jax.ShapeDtypeStruct((b * s_t, d), tgt.dtype),
        grid_spec=pl.GridSpec(
            grid=grid,
            in_specs=in_specs,
            out_specs=pl.BlockSpec((bb * s_t, d), lambda i: (i, 0)),
        ),
        compiler_params=pltpu.CompilerParams(
            dimension_semantics=("parallel",),
            # Explicit cap: above v5e's 16 MiB default, safe on v7x's 64 MiB physical.
            vmem_limit_bytes=32 * 1024 * 1024),
        cost_estimate=cost,
    )(*inputs)

    # (B*S_t, D) batch-major -> (S_t, B, D) module contract.
    return jnp.transpose(out_slab.reshape(b, s_t, d), (1, 0, 2))


class TransformerDecoderLayerPallas:
    """Inference-mode equivalent of the PyTorch TransformerDecoderLayer."""

    def __init__(self, d_model, nhead, dim_feedforward=2048, dropout=0.1,
                 activation='relu', matmul_dtype=jnp.float32,
                 key=jax.random.PRNGKey(0)):
        if activation != 'relu':
            # TODO(synk): gelu/glu activations not implemented in-kernel.
            raise NotImplementedError('only relu is implemented')
        assert d_model % nhead == 0
        self.d_model, self.nhead = d_model, nhead
        self.dim_feedforward = dim_feedforward
        self.matmul_dtype = matmul_dtype        # set jnp.bfloat16 on v6e/v7x
        d, f = d_model, dim_feedforward

        ks = jax.random.split(key, 24)

        def u(k, shape, fan_in):
            bound = 1.0 / math.sqrt(fan_in)
            return jax.random.uniform(k, shape, jnp.float32, -bound, bound)

        self.params = dict(
            # LayerNorm affine params stored as (1, D) rows for lane-dense broadcast.
            ln1_g=1.0 + 0.1 * jax.random.normal(ks[0], (1, d), jnp.float32),
            ln1_b=0.1 * jax.random.normal(ks[1], (1, d), jnp.float32),
            ln2_g=1.0 + 0.1 * jax.random.normal(ks[2], (1, d), jnp.float32),
            ln2_b=0.1 * jax.random.normal(ks[3], (1, d), jnp.float32),
            lnf_g=1.0 + 0.1 * jax.random.normal(ks[4], (1, d), jnp.float32),
            lnf_b=0.1 * jax.random.normal(ks[5], (1, d), jnp.float32),
            # Projections pre-transposed (x @ W == PyTorch x @ W_pt.T); q/k/v stored split
            # (PyTorch's in_proj_weight is simply their concatenation).
            sa_wq=u(ks[6], (d, d), d), sa_bq=u(ks[7], (1, d), d),
            sa_wk=u(ks[8], (d, d), d), sa_bk=u(ks[9], (1, d), d),
            sa_wv=u(ks[10], (d, d), d), sa_bv=u(ks[11], (1, d), d),
            sa_wo=u(ks[12], (d, d), d), sa_bo=u(ks[13], (1, d), d),
            ca_wq=u(ks[14], (d, d), d), ca_bq=u(ks[15], (1, d), d),
            ca_wk=u(ks[16], (d, d), d), ca_bk=u(ks[17], (1, d), d),
            ca_wv=u(ks[18], (d, d), d), ca_bv=u(ks[19], (1, d), d),
            ca_wo=u(ks[20], (d, d), d), ca_bo=u(ks[21], (1, d), d),
            ff_w1=u(ks[22], (d, f), d), ff_b1=jnp.zeros((1, f), jnp.float32),
            ff_w2=u(ks[23], (f, d), f), ff_b2=jnp.zeros((1, d), jnp.float32),
        )

    def __call__(self, tgt, memory, memory_mask=None, attn_mask=None,
                 tgt_padding_mask=None, pos=None, query_pos=None):
        if tgt_padding_mask is not None:
            # TODO(synk): key_padding_mask (per-batch column mask) not wired into the kernel.
            raise NotImplementedError('tgt_padding_mask is not supported')
        return transformer_decoder_layer_forward(
            self.params, tgt, memory, nhead=self.nhead,
            attn_mask=attn_mask, memory_mask=memory_mask, pos=pos,
            query_pos=query_pos, matmul_dtype=self.matmul_dtype)


# ---------------------------------------------------------------------------
# Pure-JAX reference matching the PyTorch forward (eval mode).
# ---------------------------------------------------------------------------

def _reference(params, tgt, memory, nhead, attn_mask=None, memory_mask=None,
               pos=None, query_pos=None):
    def ln(x, g, b, eps):
        mu = jnp.mean(x, -1, keepdims=True)
        var = jnp.mean((x - mu) ** 2, -1, keepdims=True)
        return (x - mu) / jnp.sqrt(var + eps) * g + b

    def mha(q_in, k_in, v_in, w_q, b_q, w_k, b_k, w_v, b_v, w_o, b_o, mask):
        sq, bb_, d = q_in.shape
        sk = k_in.shape[0]
        hd = d // nhead
        q = (q_in @ w_q + b_q[0]) * (hd ** -0.5)
        k = k_in @ w_k + b_k[0]
        v = v_in @ w_v + b_v[0]

        def split(x, s):
            return x.reshape(s, bb_, nhead, hd).transpose(1, 2, 0, 3)   # (B,H,S,hd)

        qh, kh, vh = split(q, sq), split(k, sk), split(v, sk)
        s = jnp.einsum('bhqc,bhkc->bhqk', qh, kh)
        if mask is not None:
            s = s + mask
        p = jax.nn.softmax(s, -1)
        o = jnp.einsum('bhqk,bhkc->bhqc', p, vh)
        o = o.transpose(2, 0, 1, 3).reshape(sq, bb_, d)
        return o @ w_o + b_o[0]

    x1 = ln(tgt, params['ln1_g'][0], params['ln1_b'][0], 1e-5)
    qk = x1 if query_pos is None else x1 + query_pos
    sa = mha(qk, qk, x1,
             params['sa_wq'], params['sa_bq'], params['sa_wk'], params['sa_bk'],
             params['sa_wv'], params['sa_bv'], params['sa_wo'], params['sa_bo'],
             attn_mask)
    t1 = tgt + sa
    x2 = ln(t1, params['ln2_g'][0], params['ln2_b'][0], 1e-5)
    q2 = x2 if query_pos is None else x2 + query_pos
    km = memory if pos is None else memory + pos
    ca = mha(q2, km, memory,
             params['ca_wq'], params['ca_bq'], params['ca_wk'], params['ca_bk'],
             params['ca_wv'], params['ca_bv'], params['ca_wo'], params['ca_bo'],
             memory_mask)
    t2 = t1 + ca
    xn = ln(t2, params['lnf_g'][0], params['lnf_b'][0], 1e-6)
    y = (jnp.maximum(xn @ params['ff_w1'] + params['ff_b1'][0], 0.0)
         @ params['ff_w2'] + params['ff_b2'][0])
    return t2 + y


if __name__ == "__main__":
    # Small shapes: tgt seq=8, memory seq=16, batch=2, d_model=32, heads=4, ffn=64.
    S_T, S_M, B, D, H, FF = 8, 16, 2, 32, 4, 64

    key = jax.random.PRNGKey(0)
    k1, k2, k3, k4, kp = jax.random.split(key, 5)
    tgt = jax.random.normal(k1, (S_T, B, D), jnp.float32)
    memory = jax.random.normal(k2, (S_M, B, D), jnp.float32)
    query_pos = jax.random.normal(k3, (S_T, B, D), jnp.float32)
    pos = jax.random.normal(k4, (S_M, B, D), jnp.float32)

    layer = TransformerDecoderLayerPallas(D, H, dim_feedforward=FF, dropout=0.1,
                                          activation='relu', key=kp)

    out = layer(tgt, memory, pos=pos, query_pos=query_pos)
    out = jax.block_until_ready(out)

    ref = _reference(layer.params, tgt, memory, H, pos=pos, query_pos=query_pos)
    assert out.shape == (S_T, B, D), out.shape
    max_err = float(jnp.max(jnp.abs(out - ref)))
    # Tolerance accounts for the EUP approximate reciprocal in the softmax denominator.
    assert max_err < 2e-2, max_err

    print("KERNEL_OK")
</pallas_src>

<mosaic_0001>
module attributes {stable_mosaic.version = 11 : i64} {
  func.func @kernel(%arg0: i32, %arg1: memref<16x32xf32, #tpu.memory_space<vmem>>, %arg2: memref<32x32xf32, #tpu.memory_space<vmem>>, %arg3: memref<16x32xf32, #tpu.memory_space<vmem>>, %arg4: memref<32x32xf32, #tpu.memory_space<vmem>>, %arg5: memref<1x32xf32, #tpu.memory_space<vmem>>, %arg6: memref<1x32xf32, #tpu.memory_space<vmem>>, %arg7: memref<32x32xf32, #tpu.memory_space<vmem>>, %arg8: memref<1x32xf32, #tpu.memory_space<vmem>>, %arg9: memref<32x32xf32, #tpu.memory_space<vmem>>, %arg10: memref<1x32xf32, #tpu.memory_space<vmem>>, %arg11: memref<32x32xf32, #tpu.memory_space<vmem>>, %arg12: memref<1x32xf32, #tpu.memory_space<vmem>>, %arg13: memref<32x32xf32, #tpu.memory_space<vmem>>, %arg14: memref<1x32xf32, #tpu.memory_space<vmem>>, %arg15: memref<1x32xf32, #tpu.memory_space<vmem>>, %arg16: memref<1x32xf32, #tpu.memory_space<vmem>>, %arg17: memref<32x32xf32, #tpu.memory_space<vmem>>, %arg18: memref<1x32xf32, #tpu.memory_space<vmem>>, %arg19: memref<32x32xf32, #tpu.memory_space<vmem>>, %arg20: memref<1x32xf32, #tpu.memory_space<vmem>>, %arg21: memref<32x32xf32, #tpu.memory_space<vmem>>, %arg22: memref<1x32xf32, #tpu.memory_space<vmem>>, %arg23: memref<32x32xf32, #tpu.memory_space<vmem>>, %arg24: memref<1x32xf32, #tpu.memory_space<vmem>>, %arg25: memref<1x32xf32, #tpu.memory_space<vmem>>, %arg26: memref<1x32xf32, #tpu.memory_space<vmem>>, %arg27: memref<32x64xf32, #tpu.memory_space<vmem>>, %arg28: memref<1x64xf32, #tpu.memory_space<vmem>>, %arg29: memref<64x32xf32, #tpu.memory_space<vmem>>, %arg30: memref<1x32xf32, #tpu.memory_space<vmem>>, %arg31: memref<16x32xf32, #tpu.memory_space<vmem>>) attributes {dimension_semantics = [#tpu.dimension_semantics<parallel>], iteration_bounds = array<i64: 1>, scalar_prefetch = 0 : i64, scratch_operands = 0 : i64, tpu.core_type = #tpu.core_type<tc>, window_params = [{transform_indices = @transform_0, window_bounds = array<i64: 16, 32>}, {transform_indices = @transform_1, window_bounds = array<i64: 32, 32>}, {transform_indices = @transform_2, window_bounds = array<i64: 16, 32>}, {transform_indices = @transform_3, window_bounds = array<i64: 32, 32>}, {pipeline_mode = #tpu.pipeline_mode<synchronous>, transform_indices = @transform_4, window_bounds = array<i64: 1, 32>}, {pipeline_mode = #tpu.pipeline_mode<synchronous>, transform_indices = @transform_5, window_bounds = array<i64: 1, 32>}, {pipeline_mode = #tpu.pipeline_mode<synchronous>, transform_indices = @transform_6, window_bounds = array<i64: 32, 32>}, {pipeline_mode = #tpu.pipeline_mode<synchronous>, transform_indices = @transform_7, window_bounds = array<i64: 1, 32>}, {pipeline_mode = #tpu.pipeline_mode<synchronous>, transform_indices = @transform_8, window_bounds = array<i64: 32, 32>}, {pipeline_mode = #tpu.pipeline_mode<synchronous>, transform_indices = @transform_9, window_bounds = array<i64: 1, 32>}, {pipeline_mode = #tpu.pipeline_mode<synchronous>, transform_indices = @transform_10, window_bounds = array<i64: 32, 32>}, {pipeline_mode = #tpu.pipeline_mode<synchronous>, transform_indices = @transform_11, window_bounds = array<i64: 1, 32>}, {pipeline_mode = #tpu.pipeline_mode<synchronous>, transform_indices = @transform_12, window_bounds = array<i64: 32, 32>}, {pipeline_mode = #tpu.pipeline_mode<synchronous>, transform_indices = @transform_13, window_bounds = array<i64: 1, 32>}, {pipeline_mode = #tpu.pipeline_mode<synchronous>, transform_indices = @transform_14, window_bounds = array<i64: 1, 32>}, {pipeline_mode = #tpu.pipeline_mode<synchronous>, transform_indices = @transform_15, window_bounds = array<i64: 1, 32>}, {pipeline_mode = #tpu.pipeline_mode<synchronous>, transform_indices = @transform_16, window_bounds = array<i64: 32, 32>}, {pipeline_mode = #tpu.pipeline_mode<synchronous>, transform_indices = @transform_17, window_bounds = array<i64: 1, 32>}, {pipeline_mode = #tpu.pipeline_mode<synchronous>, transform_indices = @transform_18, window_bounds = array<i64: 32, 32>}, {pipeline_mode = #tpu.pipeline_mode<synchronous>, transform_indices = @transform_19, window_bounds = array<i64: 1, 32>}, {pipeline_mode = #tpu.pipeline_mode<synchronous>, transform_indices = @transform_20, window_bounds = array<i64: 32, 32>}, {pipeline_mode = #tpu.pipeline_mode<synchronous>, transform_indices = @transform_21, window_bounds = array<i64: 1, 32>}, {pipeline_mode = #tpu.pipeline_mode<synchronous>, transform_indices = @transform_22, window_bounds = array<i64: 32, 32>}, {pipeline_mode = #tpu.pipeline_mode<synchronous>, transform_indices = @transform_23, window_bounds = array<i64: 1, 32>}, {pipeline_mode = #tpu.pipeline_mode<synchronous>, transform_indices = @transform_24, window_bounds = array<i64: 1, 32>}, {pipeline_mode = #tpu.pipeline_mode<synchronous>, transform_indices = @transform_25, window_bounds = array<i64: 1, 32>}, {pipeline_mode = #tpu.pipeline_mode<synchronous>, transform_indices = @transform_26, window_bounds = array<i64: 32, 64>}, {pipeline_mode = #tpu.pipeline_mode<synchronous>, transform_indices = @transform_27, window_bounds = array<i64: 1, 64>}, {pipeline_mode = #tpu.pipeline_mode<synchronous>, transform_indices = @transform_28, window_bounds = array<i64: 64, 32>}, {pipeline_mode = #tpu.pipeline_mode<synchronous>, transform_indices = @transform_29, window_bounds = array<i64: 1, 32>}, {transform_indices = @transform_30, window_bounds = array<i64: 16, 32>}]} {
    %c0 = arith.constant 0 : index
    %c0_0 = arith.constant 0 : index
    %0 = vector.load %arg1[%c0, %c0_0] : memref<16x32xf32, #tpu.memory_space<vmem>>, vector<16x32xf32>
    %c0_1 = arith.constant 0 : index
    %c0_2 = arith.constant 0 : index
    %1 = vector.load %arg2[%c0_1, %c0_2] : memref<32x32xf32, #tpu.memory_space<vmem>>, vector<32x32xf32>
    %c0_3 = arith.constant 0 : index
    %c0_4 = arith.constant 0 : index
    %2 = vector.load %arg3[%c0_3, %c0_4] : memref<16x32xf32, #tpu.memory_space<vmem>>, vector<16x32xf32>
    %c0_5 = arith.constant 0 : index
    %c0_6 = arith.constant 0 : index
    %3 = vector.load %arg5[%c0_5, %c0_6] : memref<1x32xf32, #tpu.memory_space<vmem>>, vector<1x32xf32>
    %c0_7 = arith.constant 0 : index
    %c0_8 = arith.constant 0 : index
    %4 = vector.load %arg6[%c0_7, %c0_8] : memref<1x32xf32, #tpu.memory_space<vmem>>, vector<1x32xf32>
    %cst = arith.constant dense<0.000000e+00> : vector<16xf32>
    %5 = vector.multi_reduction <add>, %0, %cst [1] : vector<16x32xf32> to vector<16xf32>
    %6 = vector.shape_cast %5 : vector<16xf32> to vector<16x1xf32>
    %cst_9 = arith.constant 3.200000e+01 : f32
    %7 = vector.broadcast %cst_9 : f32 to vector<16x1xf32>
    %8 = arith.divf %6, %7 : vector<16x1xf32>
    %9 = vector.broadcast %8 : vector<16x1xf32> to vector<16x32xf32>
    %10 = arith.subf %0, %9 : vector<16x32xf32>
    %11 = arith.mulf %10, %10 : vector<16x32xf32>
    %cst_10 = arith.constant dense<0.000000e+00> : vector<16xf32>
    %12 = vector.multi_reduction <add>, %11, %cst_10 [1] : vector<16x32xf32> to vector<16xf32>
    %13 = vector.shape_cast %12 : vector<16xf32> to vector<16x1xf32>
    %cst_11 = arith.constant 3.200000e+01 : f32
    %14 = vector.broadcast %cst_11 : f32 to vector<16x1xf32>
    %15 = arith.divf %13, %14 : vector<16x1xf32>
    %cst_12 = arith.constant 9.99999974E-6 : f32
    %16 = vector.broadcast %cst_12 : f32 to vector<16x1xf32>
    %17 = arith.addf %15, %16 : vector<16x1xf32>
    %18 = math.rsqrt %17 : vector<16x1xf32>
    %19 = vector.broadcast %18 : vector<16x1xf32> to vector<16x32xf32>
    %20 = arith.mulf %10, %19 : vector<16x32xf32>
    %21 = vector.broadcast %3 : vector<1x32xf32> to vector<16x32xf32>
    %22 = arith.mulf %20, %21 : vector<16x32xf32>
    %23 = vector.broadcast %4 : vector<1x32xf32> to vector<16x32xf32>
    %24 = arith.addf %22, %23 : vector<16x32xf32>
    %25 = arith.addf %24, %2 : vector<16x32xf32>
    %c0_13 = arith.constant 0 : index
    %c0_14 = arith.constant 0 : index
    %26 = vector.load %arg7[%c0_13, %c0_14] : memref<32x32xf32, #tpu.memory_space<vmem>>, vector<32x32xf32>
    %c0_15 = arith.constant 0 : index
    %c0_16 = arith.constant 0 : index
    %27 = vector.load %arg8[%c0_15, %c0_16] : memref<1x32xf32, #tpu.memory_space<vmem>>, vector<1x32xf32>
    %c0_17 = arith.constant 0 : index
    %c0_18 = arith.constant 0 : index
    %28 = vector.load %arg9[%c0_17, %c0_18] : memref<32x32xf32, #tpu.memory_space<vmem>>, vector<32x32xf32>
    %c0_19 = arith.constant 0 : index
    %c0_20 = arith.constant 0 : index
    %29 = vector.load %arg10[%c0_19, %c0_20] : memref<1x32xf32, #tpu.memory_space<vmem>>, vector<1x32xf32>
    %c0_21 = arith.constant 0 : index
    %c0_22 = arith.constant 0 : index
    %30 = vector.load %arg11[%c0_21, %c0_22] : memref<32x32xf32, #tpu.memory_space<vmem>>, vector<32x32xf32>
    %c0_23 = arith.constant 0 : index
    %c0_24 = arith.constant 0 : index
    %31 = vector.load %arg12[%c0_23, %c0_24] : memref<1x32xf32, #tpu.memory_space<vmem>>, vector<1x32xf32>
    %c0_25 = arith.constant 0 : index
    %c0_26 = arith.constant 0 : index
    %32 = vector.load %arg13[%c0_25, %c0_26] : memref<32x32xf32, #tpu.memory_space<vmem>>, vector<32x32xf32>
    %c0_27 = arith.constant 0 : index
    %c0_28 = arith.constant 0 : index
    %33 = vector.load %arg14[%c0_27, %c0_28] : memref<1x32xf32, #tpu.memory_space<vmem>>, vector<1x32xf32>
    %cst_29 = arith.constant dense<0.000000e+00> : vector<16x32xf32>
    %34 = tpu.matmul %25, %26, %cst_29 {dimension_numbers = #tpu.dot_dimension_numbers<[1], [0], [0], [1], [0, 0, 1, 1], [], []>} : vector<16x32xf32>, vector<32x32xf32>, vector<16x32xf32> -> vector<16x32xf32>
    %35 = vector.broadcast %27 : vector<1x32xf32> to vector<16x32xf32>
    %36 = arith.addf %34, %35 : vector<16x32xf32>
    %cst_30 = arith.constant dense<0.000000e+00> : vector<16x32xf32>
    %37 = tpu.matmul %25, %28, %cst_30 {dimension_numbers = #tpu.dot_dimension_numbers<[1], [0], [0], [1], [0, 0, 1, 1], [], []>} : vector<16x32xf32>, vector<32x32xf32>, vector<16x32xf32> -> vector<16x32xf32>
    %38 = vector.broadcast %29 : vector<1x32xf32> to vector<16x32xf32>
    %39 = arith.addf %37, %38 : vector<16x32xf32>
    %cst_31 = arith.constant dense<0.000000e+00> : vector<16x32xf32>
    %40 = tpu.matmul %24, %30, %cst_31 {dimension_numbers = #tpu.dot_dimension_numbers<[1], [0], [0], [1], [0, 0, 1, 1], [], []>} : vector<16x32xf32>, vector<32x32xf32>, vector<16x32xf32> -> vector<16x32xf32>
    %41 = vector.broadcast %31 : vector<1x32xf32> to vector<16x32xf32>
    %42 = arith.addf %40, %41 : vector<16x32xf32>
    %43 = vector.shape_cast %36 : vector<16x32xf32> to vector<2x8x32xf32>
    %44 = vector.extract_strided_slice %43 {offsets = [0, 0, 0], sizes = [2, 8, 8], strides = [1, 1, 1]} : vector<2x8x32xf32> to vector<2x8x8xf32>
    %45 = vector.extract_strided_slice %43 {offsets = [0, 0, 8], sizes = [2, 8, 8], strides = [1, 1, 1]} : vector<2x8x32xf32> to vector<2x8x8xf32>
    %46 = vector.extract_strided_slice %43 {offsets = [0, 0, 16], sizes = [2, 8, 8], strides = [1, 1, 1]} : vector<2x8x32xf32> to vector<2x8x8xf32>
    %47 = vector.extract_strided_slice %43 {offsets = [0, 0, 24], sizes = [2, 8, 8], strides = [1, 1, 1]} : vector<2x8x32xf32> to vector<2x8x8xf32>
    %48 = tpu.concatenate %44, %45, %46, %47 in 0 : vector<2x8x8xf32>, vector<2x8x8xf32>, vector<2x8x8xf32>, vector<2x8x8xf32> -> vector<8x8x8xf32>
    %49 = vector.shape_cast %39 : vector<16x32xf32> to vector<2x8x32xf32>
    %50 = vector.extract_strided_slice %49 {offsets = [0, 0, 0], sizes = [2, 8, 8], strides = [1, 1, 1]} : vector<2x8x32xf32> to vector<2x8x8xf32>
    %51 = vector.extract_strided_slice %49 {offsets = [0, 0, 8], sizes = [2, 8, 8], strides = [1, 1, 1]} : vector<2x8x32xf32> to vector<2x8x8xf32>
    %52 = vector.extract_strided_slice %49 {offsets = [0, 0, 16], sizes = [2, 8, 8], strides = [1, 1, 1]} : vector<2x8x32xf32> to vector<2x8x8xf32>
    %53 = vector.extract_strided_slice %49 {offsets = [0, 0, 24], sizes = [2, 8, 8], strides = [1, 1, 1]} : vector<2x8x32xf32> to vector<2x8x8xf32>
    %54 = tpu.concatenate %50, %51, %52, %53 in 0 : vector<2x8x8xf32>, vector<2x8x8xf32>, vector<2x8x8xf32>, vector<2x8x8xf32> -> vector<8x8x8xf32>
    %55 = vector.shape_cast %42 : vector<16x32xf32> to vector<2x8x32xf32>
    %56 = vector.extract_strided_slice %55 {offsets = [0, 0, 0], sizes = [2, 8, 8], strides = [1, 1, 1]} : vector<2x8x32xf32> to vector<2x8x8xf32>
    %57 = vector.extract_strided_slice %55 {offsets = [0, 0, 8], sizes = [2, 8, 8], strides = [1, 1, 1]} : vector<2x8x32xf32> to vector<2x8x8xf32>
    %58 = vector.extract_strided_slice %55 {offsets = [0, 0, 16], sizes = [2, 8, 8], strides = [1, 1, 1]} : vector<2x8x32xf32> to vector<2x8x8xf32>
    %59 = vector.extract_strided_slice %55 {offsets = [0, 0, 24], sizes = [2, 8, 8], strides = [1, 1, 1]} : vector<2x8x32xf32> to vector<2x8x8xf32>
    %60 = tpu.concatenate %56, %57, %58, %59 in 0 : vector<2x8x8xf32>, vector<2x8x8xf32>, vector<2x8x8xf32>, vector<2x8x8xf32> -> vector<8x8x8xf32>
    "tpu.trace_start"() <{level = 10 : i32, message = "bqc,bkc->bqk"}> : () -> ()
    %cst_32 = arith.constant dense<0.000000e+00> : vector<8x8x8xf32>
    %61 = tpu.matmul %48, %54, %cst_32 {dimension_numbers = #tpu.dot_dimension_numbers<[2], [2], [1], [1], [0, 0, 0, 1, 1, 1], [0], [0]>} : vector<8x8x8xf32>, vector<8x8x8xf32>, vector<8x8x8xf32> -> vector<8x8x8xf32>
    "tpu.trace_stop"() : () -> ()
    %cst_33 = arith.constant dense<0xFF800000> : vector<8x8xf32>
    %62 = vector.multi_reduction <maximumf>, %61, %cst_33 [2] : vector<8x8x8xf32> to vector<8x8xf32>
    %63 = vector.shape_cast %62 : vector<8x8xf32> to vector<8x8x1xf32>
    %64 = vector.broadcast %63 : vector<8x8x1xf32> to vector<8x8x8xf32>
    %65 = arith.subf %61, %64 : vector<8x8x8xf32>
    %66 = math.exp %65 : vector<8x8x8xf32>
    %cst_34 = arith.constant dense<0.000000e+00> : vector<8x8xf32>
    %67 = vector.multi_reduction <add>, %66, %cst_34 [2] : vector<8x8x8xf32> to vector<8x8xf32>
    %68 = vector.shape_cast %67 : vector<8x8xf32> to vector<8x8x1xf32>
    %69 = tpu.reciprocal %68 {approx = true} : vector<8x8x1xf32> -> vector<8x8x1xf32>
    %70 = vector.broadcast %69 : vector<8x8x1xf32> to vector<8x8x8xf32>
    %71 = arith.mulf %66, %70 : vector<8x8x8xf32>
    "tpu.trace_start"() <{level = 10 : i32, message = "bqk,bkc->bqc"}> : () -> ()
    %cst_35 = arith.constant dense<0.000000e+00> : vector<8x8x8xf32>
    %72 = tpu.matmul %71, %60, %cst_35 {dimension_numbers = #tpu.dot_dimension_numbers<[2], [1], [1], [2], [0, 0, 0, 1, 1, 2], [0], [0]>} : vector<8x8x8xf32>, vector<8x8x8xf32>, vector<8x8x8xf32> -> vector<8x8x8xf32>
    "tpu.trace_stop"() : () -> ()
    %73 = vector.extract_strided_slice %72 {offsets = [0, 0, 0], sizes = [2, 8, 8], strides = [1, 1, 1]} : vector<8x8x8xf32> to vector<2x8x8xf32>
    %74 = vector.shape_cast %73 : vector<2x8x8xf32> to vector<16x8xf32>
    %75 = vector.extract_strided_slice %72 {offsets = [2, 0, 0], sizes = [2, 8, 8], strides = [1, 1, 1]} : vector<8x8x8xf32> to vector<2x8x8xf32>
    %76 = vector.shape_cast %75 : vector<2x8x8xf32> to vector<16x8xf32>
    %77 = vector.extract_strided_slice %72 {offsets = [4, 0, 0], sizes = [2, 8, 8], strides = [1, 1, 1]} : vector<8x8x8xf32> to vector<2x8x8xf32>
    %78 = vector.shape_cast %77 : vector<2x8x8xf32> to vector<16x8xf32>
    %79 = vector.extract_strided_slice %72 {offsets = [6, 0, 0], sizes = [2, 8, 8], strides = [1, 1, 1]} : vector<8x8x8xf32> to vector<2x8x8xf32>
    %80 = vector.shape_cast %79 : vector<2x8x8xf32> to vector<16x8xf32>
    %81 = tpu.concatenate %74, %76, %78, %80 in 1 : vector<16x8xf32>, vector<16x8xf32>, vector<16x8xf32>, vector<16x8xf32> -> vector<16x32xf32>
    %cst_36 = arith.constant dense<0.000000e+00> : vector<16x32xf32>
    %82 = tpu.matmul %81, %32, %cst_36 {dimension_numbers = #tpu.dot_dimension_numbers<[1], [0], [0], [1], [0, 0, 1, 1], [], []>} : vector<16x32xf32>, vector<32x32xf32>, vector<16x32xf32> -> vector<16x32xf32>
    %83 = vector.broadcast %33 : vector<1x32xf32> to vector<16x32xf32>
    %84 = arith.addf %82, %83 : vector<16x32xf32>
    %85 = arith.addf %0, %84 : vector<16x32xf32>
    %c0_37 = arith.constant 0 : index
    %c0_38 = arith.constant 0 : index
    %86 = vector.load %arg15[%c0_37, %c0_38] : memref<1x32xf32, #tpu.memory_space<vmem>>, vector<1x32xf32>
    %c0_39 = arith.constant 0 : index
    %c0_40 = arith.constant 0 : index
    %87 = vector.load %arg16[%c0_39, %c0_40] : memref<1x32xf32, #tpu.memory_space<vmem>>, vector<1x32xf32>
    %cst_41 = arith.constant dense<0.000000e+00> : vector<16xf32>
    %88 = vector.multi_reduction <add>, %85, %cst_41 [1] : vector<16x32xf32> to vector<16xf32>
    %89 = vector.shape_cast %88 : vector<16xf32> to vector<16x1xf32>
    %cst_42 = arith.constant 3.200000e+01 : f32
    %90 = vector.broadcast %cst_42 : f32 to vector<16x1xf32>
    %91 = arith.divf %89, %90 : vector<16x1xf32>
    %92 = vector.broadcast %91 : vector<16x1xf32> to vector<16x32xf32>
    %93 = arith.subf %85, %92 : vector<16x32xf32>
    %94 = arith.mulf %93, %93 : vector<16x32xf32>
    %cst_43 = arith.constant dense<0.000000e+00> : vector<16xf32>
    %95 = vector.multi_reduction <add>, %94, %cst_43 [1] : vector<16x32xf32> to vector<16xf32>
    %96 = vector.shape_cast %95 : vector<16xf32> to vector<16x1xf32>
    %cst_44 = arith.constant 3.200000e+01 : f32
    %97 = vector.broadcast %cst_44 : f32 to vector<16x1xf32>
    %98 = arith.divf %96, %97 : vector<16x1xf32>
    %cst_45 = arith.constant 9.99999974E-6 : f32
    %99 = vector.broadcast %cst_45 : f32 to vector<16x1xf32>
    %100 = arith.addf %98, %99 : vector<16x1xf32>
    %101 = math.rsqrt %100 : vector<16x1xf32>
    %102 = vector.broadcast %101 : vector<16x1xf32> to vector<16x32xf32>
    %103 = arith.mulf %93, %102 : vector<16x32xf32>
    %104 = vector.broadcast %86 : vector<1x32xf32> to vector<16x32xf32>
    %105 = arith.mulf %103, %104 : vector<16x32xf32>
    %106 = vector.broadcast %87 : vector<1x32xf32> to vector<16x32xf32>
    %107 = arith.addf %105, %106 : vector<16x32xf32>
    %108 = arith.addf %107, %2 : vector<16x32xf32>
    %c0_46 = arith.constant 0 : index
    %c0_47 = arith.constant 0 : index
    %109 = vector.load %arg4[%c0_46, %c0_47] : memref<32x32xf32, #tpu.memory_space<vmem>>, vector<32x32xf32>
    %110 = arith.addf %1, %109 : vector<32x32xf32>
    %c0_48 = arith.constant 0 : index
    %c0_49 = arith.constant 0 : index
    %111 = vector.load %arg17[%c0_48, %c0_49] : memref<32x32xf32, #tpu.memory_space<vmem>>, vector<32x32xf32>
    %c0_50 = arith.constant 0 : index
    %c0_51 = arith.constant 0 : index
    %112 = vector.load %arg18[%c0_50, %c0_51] : memref<1x32xf32, #tpu.memory_space<vmem>>, vector<1x32xf32>
    %c0_52 = arith.constant 0 : index
    %c0_53 = arith.constant 0 : index
    %113 = vector.load %arg19[%c0_52, %c0_53] : memref<32x32xf32, #tpu.memory_space<vmem>>, vector<32x32xf32>
    %c0_54 = arith.constant 0 : index
    %c0_55 = arith.constant 0 : index
    %114 = vector.load %arg20[%c0_54, %c0_55] : memref<1x32xf32, #tpu.memory_space<vmem>>, vector<1x32xf32>
    %c0_56 = arith.constant 0 : index
    %c0_57 = arith.constant 0 : index
    %115 = vector.load %arg21[%c0_56, %c0_57] : memref<32x32xf32, #tpu.memory_space<vmem>>, vector<32x32xf32>
    %c0_58 = arith.constant 0 : index
    %c0_59 = arith.constant 0 : index
    %116 = vector.load %arg22[%c0_58, %c0_59] : memref<1x32xf32, #tpu.memory_space<vmem>>, vector<1x32xf32>
    %c0_60 = arith.constant 0 : index
    %c0_61 = arith.constant 0 : index
    %117 = vector.load %arg23[%c0_60, %c0_61] : memref<32x32xf32, #tpu.memory_space<vmem>>, vector<32x32xf32>
    %c0_62 = arith.constant 0 : index
    %c0_63 = arith.constant 0 : index
    %118 = vector.load %arg24[%c0_62, %c0_63] : memref<1x32xf32, #tpu.memory_space<vmem>>, vector<1x32xf32>
    %cst_64 = arith.constant dense<0.000000e+00> : vector<16x32xf32>
    %119 = tpu.matmul %108, %111, %cst_64 {dimension_numbers = #tpu.dot_dimension_numbers<[1], [0], [0], [1], [0, 0, 1, 1], [], []>} : vector<16x32xf32>, vector<32x32xf32>, vector<16x32xf32> -> vector<16x32xf32>
    %120 = vector.broadcast %112 : vector<1x32xf32> to vector<16x32xf32>
    %121 = arith.addf %119, %120 : vector<16x32xf32>
    %cst_65 = arith.constant dense<0.000000e+00> : vector<32x32xf32>
    %122 = tpu.matmul %110, %113, %cst_65 {dimension_numbers = #tpu.dot_dimension_numbers<[1], [0], [0], [1], [0, 0, 1, 1], [], []>} : vector<32x32xf32>, vector<32x32xf32>, vector<32x32xf32> -> vector<32x32xf32>
    %123 = vector.broadcast %114 : vector<1x32xf32> to vector<32x32xf32>
    %124 = arith.addf %122, %123 : vector<32x32xf32>
    %cst_66 = arith.constant dense<0.000000e+00> : vector<32x32xf32>
    %125 = tpu.matmul %1, %115, %cst_66 {dimension_numbers = #tpu.dot_dimension_numbers<[1], [0], [0], [1], [0, 0, 1, 1], [], []>} : vector<32x32xf32>, vector<32x32xf32>, vector<32x32xf32> -> vector<32x32xf32>
    %126 = vector.broadcast %116 : vector<1x32xf32> to vector<32x32xf32>
    %127 = arith.addf %125, %126 : vector<32x32xf32>
    %128 = vector.shape_cast %121 : vector<16x32xf32> to vector<2x8x32xf32>
    %129 = vector.extract_strided_slice %128 {offsets = [0, 0, 0], sizes = [2, 8, 8], strides = [1, 1, 1]} : vector<2x8x32xf32> to vector<2x8x8xf32>
    %130 = vector.extract_strided_slice %128 {offsets = [0, 0, 8], sizes = [2, 8, 8], strides = [1, 1, 1]} : vector<2x8x32xf32> to vector<2x8x8xf32>
    %131 = vector.extract_strided_slice %128 {offsets = [0, 0, 16], sizes = [2, 8, 8], strides = [1, 1, 1]} : vector<2x8x32xf32> to vector<2x8x8xf32>
    %132 = vector.extract_strided_slice %128 {offsets = [0, 0, 24], sizes = [2, 8, 8], strides = [1, 1, 1]} : vector<2x8x32xf32> to vector<2x8x8xf32>
    %133 = tpu.concatenate %129, %130, %131, %132 in 0 : vector<2x8x8xf32>, vector<2x8x8xf32>, vector<2x8x8xf32>, vector<2x8x8xf32> -> vector<8x8x8xf32>
    %134 = vector.shape_cast %124 : vector<32x32xf32> to vector<2x16x32xf32>
    %135 = vector.extract_strided_slice %134 {offsets = [0, 0, 0], sizes = [2, 16, 8], strides = [1, 1, 1]} : vector<2x16x32xf32> to vector<2x16x8xf32>
    %136 = vector.extract_strided_slice %134 {offsets = [0, 0, 8], sizes = [2, 16, 8], strides = [1, 1, 1]} : vector<2x16x32xf32> to vector<2x16x8xf32>
    %137 = vector.extract_strided_slice %134 {offsets = [0, 0, 16], sizes = [2, 16, 8], strides = [1, 1, 1]} : vector<2x16x32xf32> to vector<2x16x8xf32>
    %138 = vector.extract_strided_slice %134 {offsets = [0, 0, 24], sizes = [2, 16, 8], strides = [1, 1, 1]} : vector<2x16x32xf32> to vector<2x16x8xf32>
    %139 = tpu.concatenate %135, %136, %137, %138 in 0 : vector<2x16x8xf32>, vector<2x16x8xf32>, vector<2x16x8xf32>, vector<2x16x8xf32> -> vector<8x16x8xf32>
    %140 = vector.shape_cast %127 : vector<32x32xf32> to vector<2x16x32xf32>
    %141 = vector.extract_strided_slice %140 {offsets = [0, 0, 0], sizes = [2, 16, 8], strides = [1, 1, 1]} : vector<2x16x32xf32> to vector<2x16x8xf32>
    %142 = vector.extract_strided_slice %140 {offsets = [0, 0, 8], sizes = [2, 16, 8], strides = [1, 1, 1]} : vector<2x16x32xf32> to vector<2x16x8xf32>
    %143 = vector.extract_strided_slice %140 {offsets = [0, 0, 16], sizes = [2, 16, 8], strides = [1, 1, 1]} : vector<2x16x32xf32> to vector<2x16x8xf32>
    %144 = vector.extract_strided_slice %140 {offsets = [0, 0, 24], sizes = [2, 16, 8], strides = [1, 1, 1]} : vector<2x16x32xf32> to vector<2x16x8xf32>
    %145 = tpu.concatenate %141, %142, %143, %144 in 0 : vector<2x16x8xf32>, vector<2x16x8xf32>, vector<2x16x8xf32>, vector<2x16x8xf32> -> vector<8x16x8xf32>
    "tpu.trace_start"() <{level = 10 : i32, message = "bqc,bkc->bqk"}> : () -> ()
    %cst_67 = arith.constant dense<0.000000e+00> : vector<8x8x16xf32>
    %146 = tpu.matmul %133, %139, %cst_67 {dimension_numbers = #tpu.dot_dimension_numbers<[2], [2], [1], [1], [0, 0, 0, 1, 1, 1], [0], [0]>} : vector<8x8x8xf32>, vector<8x16x8xf32>, vector<8x8x16xf32> -> vector<8x8x16xf32>
    "tpu.trace_stop"() : () -> ()
    %cst_68 = arith.constant dense<0xFF800000> : vector<8x8xf32>
    %147 = vector.multi_reduction <maximumf>, %146, %cst_68 [2] : vector<8x8x16xf32> to vector<8x8xf32>
    %148 = vector.shape_cast %147 : vector<8x8xf32> to vector<8x8x1xf32>
    %149 = vector.broadcast %148 : vector<8x8x1xf32> to vector<8x8x16xf32>
    %150 = arith.subf %146, %149 : vector<8x8x16xf32>
    %151 = math.exp %150 : vector<8x8x16xf32>
    %cst_69 = arith.constant dense<0.000000e+00> : vector<8x8xf32>
    %152 = vector.multi_reduction <add>, %151, %cst_69 [2] : vector<8x8x16xf32> to vector<8x8xf32>
    %153 = vector.shape_cast %152 : vector<8x8xf32> to vector<8x8x1xf32>
    %154 = tpu.reciprocal %153 {approx = true} : vector<8x8x1xf32> -> vector<8x8x1xf32>
    %155 = vector.broadcast %154 : vector<8x8x1xf32> to vector<8x8x16xf32>
    %156 = arith.mulf %151, %155 : vector<8x8x16xf32>
    "tpu.trace_start"() <{level = 10 : i32, message = "bqk,bkc->bqc"}> : () -> ()
    %cst_70 = arith.constant dense<0.000000e+00> : vector<8x8x8xf32>
    %157 = tpu.matmul %156, %145, %cst_70 {dimension_numbers = #tpu.dot_dimension_numbers<[2], [1], [1], [2], [0, 0, 0, 1, 1, 2], [0], [0]>} : vector<8x8x16xf32>, vector<8x16x8xf32>, vector<8x8x8xf32> -> vector<8x8x8xf32>
    "tpu.trace_stop"() : () -> ()
    %158 = vector.extract_strided_slice %157 {offsets = [0, 0, 0], sizes = [2, 8, 8], strides = [1, 1, 1]} : vector<8x8x8xf32> to vector<2x8x8xf32>
    %159 = vector.shape_cast %158 : vector<2x8x8xf32> to vector<16x8xf32>
    %160 = vector.extract_strided_slice %157 {offsets = [2, 0, 0], sizes = [2, 8, 8], strides = [1, 1, 1]} : vector<8x8x8xf32> to vector<2x8x8xf32>
    %161 = vector.shape_cast %160 : vector<2x8x8xf32> to vector<16x8xf32>
    %162 = vector.extract_strided_slice %157 {offsets = [4, 0, 0], sizes = [2, 8, 8], strides = [1, 1, 1]} : vector<8x8x8xf32> to vector<2x8x8xf32>
    %163 = vector.shape_cast %162 : vector<2x8x8xf32> to vector<16x8xf32>
    %164 = vector.extract_strided_slice %157 {offsets = [6, 0, 0], sizes = [2, 8, 8], strides = [1, 1, 1]} : vector<8x8x8xf32> to vector<2x8x8xf32>
    %165 = vector.shape_cast %164 : vector<2x8x8xf32> to vector<16x8xf32>
    %166 = tpu.concatenate %159, %161, %163, %165 in 1 : vector<16x8xf32>, vector<16x8xf32>, vector<16x8xf32>, vector<16x8xf32> -> vector<16x32xf32>
    %cst_71 = arith.constant dense<0.000000e+00> : vector<16x32xf32>
    %167 = tpu.matmul %166, %117, %cst_71 {dimension_numbers = #tpu.dot_dimension_numbers<[1], [0], [0], [1], [0, 0, 1, 1], [], []>} : vector<16x32xf32>, vector<32x32xf32>, vector<16x32xf32> -> vector<16x32xf32>
    %168 = vector.broadcast %118 : vector<1x32xf32> to vector<16x32xf32>
    %169 = arith.addf %167, %168 : vector<16x32xf32>
    %170 = arith.addf %85, %169 : vector<16x32xf32>
    %c0_72 = arith.constant 0 : index
    %c0_73 = arith.constant 0 : index
    %171 = vector.load %arg25[%c0_72, %c0_73] : memref<1x32xf32, #tpu.memory_space<vmem>>, vector<1x32xf32>
    %c0_74 = arith.constant 0 : index
    %c0_75 = arith.constant 0 : index
    %172 = vector.load %arg26[%c0_74, %c0_75] : memref<1x32xf32, #tpu.memory_space<vmem>>, vector<1x32xf32>
    %cst_76 = arith.constant dense<0.000000e+00> : vector<16xf32>
    %173 = vector.multi_reduction <add>, %170, %cst_76 [1] : vector<16x32xf32> to vector<16xf32>
    %174 = vector.shape_cast %173 : vector<16xf32> to vector<16x1xf32>
    %cst_77 = arith.constant 3.200000e+01 : f32
    %175 = vector.broadcast %cst_77 : f32 to vector<16x1xf32>
    %176 = arith.divf %174, %175 : vector<16x1xf32>
    %177 = vector.broadcast %176 : vector<16x1xf32> to vector<16x32xf32>
    %178 = arith.subf %170, %177 : vector<16x32xf32>
    %179 = arith.mulf %178, %178 : vector<16x32xf32>
    %cst_78 = arith.constant dense<0.000000e+00> : vector<16xf32>
    %180 = vector.multi_reduction <add>, %179, %cst_78 [1] : vector<16x32xf32> to vector<16xf32>
    %181 = vector.shape_cast %180 : vector<16xf32> to vector<16x1xf32>
    %cst_79 = arith.constant 3.200000e+01 : f32
    %182 = vector.broadcast %cst_79 : f32 to vector<16x1xf32>
    %183 = arith.divf %181, %182 : vector<16x1xf32>
    %cst_80 = arith.constant 9.99999997E-7 : f32
    %184 = vector.broadcast %cst_80 : f32 to vector<16x1xf32>
    %185 = arith.addf %183, %184 : vector<16x1xf32>
    %186 = math.rsqrt %185 : vector<16x1xf32>
    %187 = vector.broadcast %186 : vector<16x1xf32> to vector<16x32xf32>
    %188 = arith.mulf %178, %187 : vector<16x32xf32>
    %189 = vector.broadcast %171 : vector<1x32xf32> to vector<16x32xf32>
    %190 = arith.mulf %188, %189 : vector<16x32xf32>
    %191 = vector.broadcast %172 : vector<1x32xf32> to vector<16x32xf32>
    %192 = arith.addf %190, %191 : vector<16x32xf32>
    %c0_81 = arith.constant 0 : index
    %c0_82 = arith.constant 0 : index
    %193 = vector.load %arg27[%c0_81, %c0_82] : memref<32x64xf32, #tpu.memory_space<vmem>>, vector<32x64xf32>
    %cst_83 = arith.constant dense<0.000000e+00> : vector<16x64xf32>
    %194 = tpu.matmul %192, %193, %cst_83 {dimension_numbers = #tpu.dot_dimension_numbers<[1], [0], [0], [1], [0, 0, 1, 1], [], []>} : vector<16x32xf32>, vector<32x64xf32>, vector<16x64xf32> -> vector<16x64xf32>
    %c0_84 = arith.constant 0 : index
    %c0_85 = arith.constant 0 : index
    %195 = vector.load %arg28[%c0_84, %c0_85] : memref<1x64xf32, #tpu.memory_space<vmem>>, vector<1x64xf32>
    %196 = vector.broadcast %195 : vector<1x64xf32> to vector<16x64xf32>
    %197 = arith.addf %194, %196 : vector<16x64xf32>
    %cst_86 = arith.constant 0.000000e+00 : f32
    %198 = vector.broadcast %cst_86 : f32 to vector<16x64xf32>
    %199 = arith.maximumf %197, %198 : vector<16x64xf32>
    %c0_87 = arith.constant 0 : index
    %c0_88 = arith.constant 0 : index
    %200 = vector.load %arg29[%c0_87, %c0_88] : memref<64x32xf32, #tpu.memory_space<vmem>>, vector<64x32xf32>
    %cst_89 = arith.constant dense<0.000000e+00> : vector<16x32xf32>
    %201 = tpu.matmul %199, %200, %cst_89 {dimension_numbers = #tpu.dot_dimension_numbers<[1], [0], [0], [1], [0, 0, 1, 1], [], []>} : vector<16x64xf32>, vector<64x32xf32>, vector<16x32xf32> -> vector<16x32xf32>
    %c0_90 = arith.constant 0 : index
    %c0_91 = arith.constant 0 : index
    %202 = vector.load %arg30[%c0_90, %c0_91] : memref<1x32xf32, #tpu.memory_space<vmem>>, vector<1x32xf32>
    %203 = vector.broadcast %202 : vector<1x32xf32> to vector<16x32xf32>
    %204 = arith.addf %201, %203 : vector<16x32xf32>
    %205 = arith.addf %170, %204 : vector<16x32xf32>
    %c0_92 = arith.constant 0 : index
    %c0_93 = arith.constant 0 : index
    %206 = vector.load %arg31[%c0_92, %c0_93] : memref<16x32xf32, #tpu.memory_space<vmem>>, vector<16x32xf32>
    tpu.vector_store %arg31[%c0_92, %c0_93], %205 {strides = array<i32>} : memref<16x32xf32, #tpu.memory_space<vmem>>, vector<16x32xf32>,
    return
  }
  func.func @transform_0(%arg0: i32) -> (i32, i32) {
    %c0_i32 = arith.constant 0 : i32
    %c0_i32_0 = arith.constant 0 : i32
    return %arg0, %c0_i32 : i32, i32
  }
  func.func @transform_1(%arg0: i32) -> (i32, i32) {
    %c0_i32 = arith.constant 0 : i32
    %c0_i32_0 = arith.constant 0 : i32
    return %arg0, %c0_i32 : i32, i32
  }
  func.func @transform_2(%arg0: i32) -> (i32, i32) {
    %c0_i32 = arith.constant 0 : i32
    %c0_i32_0 = arith.constant 0 : i32
    return %arg0, %c0_i32 : i32, i32
  }
  func.func @transform_3(%arg0: i32) -> (i32, i32) {
    %c0_i32 = arith.constant 0 : i32
    %c0_i32_0 = arith.constant 0 : i32
    return %arg0, %c0_i32 : i32, i32
  }
  func.func @transform_4(%arg0: i32) -> (i32, i32) {
    %c0_i32 = arith.constant 0 : i32
    %c0_i32_0 = arith.constant 0 : i32
    %c0_i32_1 = arith.constant 0 : i32
    return %c0_i32, %c0_i32_0 : i32, i32
  }
  func.func @transform_5(%arg0: i32) -> (i32, i32) {
    %c0_i32 = arith.constant 0 : i32
    %c0_i32_0 = arith.constant 0 : i32
    %c0_i32_1 = arith.constant 0 : i32
    return %c0_i32, %c0_i32_0 : i32, i32
  }
  func.func @transform_6(%arg0: i32) -> (i32, i32) {
    %c0_i32 = arith.constant 0 : i32
    %c0_i32_0 = arith.constant 0 : i32
    %c0_i32_1 = arith.constant 0 : i32
    return %c0_i32, %c0_i32_0 : i32, i32
  }
  func.func @transform_7(%arg0: i32) -> (i32, i32) {
    %c0_i32 = arith.constant 0 : i32
    %c0_i32_0 = arith.constant 0 : i32
    %c0_i32_1 = arith.constant 0 : i32
    return %c0_i32, %c0_i32_0 : i32, i32
  }
  func.func @transform_8(%arg0: i32) -> (i32, i32) {
    %c0_i32 = arith.constant 0 : i32
    %c0_i32_0 = arith.constant 0 : i32
    %c0_i32_1 = arith.constant 0 : i32
    return %c0_i32, %c0_i32_0 : i32, i32
  }
  func.func @transform_9(%arg0: i32) -> (i32, i32) {
    %c0_i32 = arith.constant 0 : i32
    %c0_i32_0 = arith.constant 0 : i32
    %c0_i32_1 = arith.constant 0 : i32
    return %c0_i32, %c0_i32_0 : i32, i32
  }
  func.func @transform_10(%arg0: i32) -> (i32, i32) {
    %c0_i32 = arith.constant 0 : i32
    %c0_i32_0 = arith.constant 0 : i32
    %c0_i32_1 = arith.constant 0 : i32
    return %c0_i32, %c0_i32_0 : i32, i32
  }
  func.func @transform_11(%arg0: i32) -> (i32, i32) {
    %c0_i32 = arith.constant 0 : i32
    %c0_i32_0 = arith.constant 0 : i32
    %c0_i32_1 = arith.constant 0 : i32
    return %c0_i32, %c0_i32_0 : i32, i32
  }
  func.func @transform_12(%arg0: i32) -> (i32, i32) {
    %c0_i32 = arith.constant 0 : i32
    %c0_i32_0 = arith.constant 0 : i32
    %c0_i32_1 = arith.constant 0 : i32
    return %c0_i32, %c0_i32_0 : i32, i32
  }
  func.func @transform_13(%arg0: i32) -> (i32, i32) {
    %c0_i32 = arith.constant 0 : i32
    %c0_i32_0 = arith.constant 0 : i32
    %c0_i32_1 = arith.constant 0 : i32
    return %c0_i32, %c0_i32_0 : i32, i32
  }
  func.func @transform_14(%arg0: i32) -> (i32, i32) {
    %c0_i32 = arith.constant 0 : i32
    %c0_i32_0 = arith.constant 0 : i32
    %c0_i32_1 = arith.constant 0 : i32
    return %c0_i32, %c0_i32_0 : i32, i32
  }
  func.func @transform_15(%arg0: i32) -> (i32, i32) {
    %c0_i32 = arith.constant 0 : i32
    %c0_i32_0 = arith.constant 0 : i32
    %c0_i32_1 = arith.constant 0 : i32
    return %c0_i32, %c0_i32_0 : i32, i32
  }
  func.func @transform_16(%arg0: i32) -> (i32, i32) {
    %c0_i32 = arith.constant 0 : i32
    %c0_i32_0 = arith.constant 0 : i32
    %c0_i32_1 = arith.constant 0 : i32
    return %c0_i32, %c0_i32_0 : i32, i32
  }
  func.func @transform_17(%arg0: i32) -> (i32, i32) {
    %c0_i32 = arith.constant 0 : i32
    %c0_i32_0 = arith.constant 0 : i32
    %c0_i32_1 = arith.constant 0 : i32
    return %c0_i32, %c0_i32_0 : i32, i32
  }
  func.func @transform_18(%arg0: i32) -> (i32, i32) {
    %c0_i32 = arith.constant 0 : i32
    %c0_i32_0 = arith.constant 0 : i32
    %c0_i32_1 = arith.constant 0 : i32
    return %c0_i32, %c0_i32_0 : i32, i32
  }
  func.func @transform_19(%arg0: i32) -> (i32, i32) {
    %c0_i32 = arith.constant 0 : i32
    %c0_i32_0 = arith.constant 0 : i32
    %c0_i32_1 = arith.constant 0 : i32
    return %c0_i32, %c0_i32_0 : i32, i32
  }
  func.func @transform_20(%arg0: i32) -> (i32, i32) {
    %c0_i32 = arith.constant 0 : i32
    %c0_i32_0 = arith.constant 0 : i32
    %c0_i32_1 = arith.constant 0 : i32
    return %c0_i32, %c0_i32_0 : i32, i32
  }
  func.func @transform_21(%arg0: i32) -> (i32, i32) {
    %c0_i32 = arith.constant 0 : i32
    %c0_i32_0 = arith.constant 0 : i32
    %c0_i32_1 = arith.constant 0 : i32
    return %c0_i32, %c0_i32_0 : i32, i32
  }
  func.func @transform_22(%arg0: i32) -> (i32, i32) {
    %c0_i32 = arith.constant 0 : i32
    %c0_i32_0 = arith.constant 0 : i32
    %c0_i32_1 = arith.constant 0 : i32
    return %c0_i32, %c0_i32_0 : i32, i32
  }
  func.func @transform_23(%arg0: i32) -> (i32, i32) {
    %c0_i32 = arith.constant 0 : i32
    %c0_i32_0 = arith.constant 0 : i32
    %c0_i32_1 = arith.constant 0 : i32
    return %c0_i32, %c0_i32_0 : i32, i32
  }
  func.func @transform_24(%arg0: i32) -> (i32, i32) {
    %c0_i32 = arith.constant 0 : i32
    %c0_i32_0 = arith.constant 0 : i32
    %c0_i32_1 = arith.constant 0 : i32
    return %c0_i32, %c0_i32_0 : i32, i32
  }
  func.func @transform_25(%arg0: i32) -> (i32, i32) {
    %c0_i32 = arith.constant 0 : i32
    %c0_i32_0 = arith.constant 0 : i32
    %c0_i32_1 = arith.constant 0 : i32
    return %c0_i32, %c0_i32_0 : i32, i32
  }
  func.func @transform_26(%arg0: i32) -> (i32, i32) {
    %c0_i32 = arith.constant 0 : i32
    %c0_i32_0 = arith.constant 0 : i32
    %c0_i32_1 = arith.constant 0 : i32
    return %c0_i32, %c0_i32_0 : i32, i32
  }
  func.func @transform_27(%arg0: i32) -> (i32, i32) {
    %c0_i32 = arith.constant 0 : i32
    %c0_i32_0 = arith.constant 0 : i32
    %c0_i32_1 = arith.constant 0 : i32
    return %c0_i32, %c0_i32_0 : i32, i32
  }
  func.func @transform_28(%arg0: i32) -> (i32, i32) {
    %c0_i32 = arith.constant 0 : i32
    %c0_i32_0 = arith.constant 0 : i32
    %c0_i32_1 = arith.constant 0 : i32
    return %c0_i32, %c0_i32_0 : i32, i32
  }
  func.func @transform_29(%arg0: i32) -> (i32, i32) {
    %c0_i32 = arith.constant 0 : i32
    %c0_i32_0 = arith.constant 0 : i32
    %c0_i32_1 = arith.constant 0 : i32
    return %c0_i32, %c0_i32_0 : i32, i32
  }
  func.func @transform_30(%arg0: i32) -> (i32, i32) {
    %c0_i32 = arith.constant 0 : i32
    %c0_i32_0 = arith.constant 0 : i32
    return %arg0, %c0_i32 : i32, i32
  }
}

</mosaic_0001>

<bundles_post_ra>
// kernel: tpu_custom_call.1
= control target key start
LH: loop header
LB: loop body
LE: loop exit
PB: predicated region body
PF: predicated region fallthrough
CT: control target
= control target key end

     0   :  { %s5087_s6 = smov 1   ;;  %s5088_s10 = smov 2   ;;  %s5815_s0 = inlined_call_operand.smem [shape: u32[31], index: -1, kind: input, shape index: {}] }
   0x1   :  { %s5145_s5 = sld [smem:[%s5815_s0]]   ;;  %s5089_s14 = smov 3  }
   0x2   :  { %s5150_s9 = sld [smem:[%s5815_s0 + %s5087_s6]]   ;;  %s5090_s18 = smov 4  }
   0x3   :  { %s5155_s13 = sld [smem:[%s5815_s0 + %s5088_s10]]   ;;  %s5091_s22 = smov 5  }
   0x4   :  { %s5160_s17 = sld [smem:[%s5815_s0 + %s5089_s14]]   ;;  %s5092_s26 = smov 6  }
   0x5   :  { %s5165_s21 = sld [smem:[%s5815_s0 + %s5090_s18]]   ;;  %s5093_s30 = smov 7  }
   0x6   :  { %s5170_s25 = sld [smem:[%s5815_s0 + %s5091_s22]]   ;;  %s5094_s4 = smov 8  }
   0x7   :  { %s5175_s29 = sld [smem:[%s5815_s0 + %s5092_s26]]   ;;  %s5095_s10 = smov 9  }
   0x8   :  { %5818 = sst [smem:[#allocation27_spill]] %s5150_s9  ;;  %s5096_s15 = smov 10  }
   0x9   :  { %s5180_s3 = sld [smem:[%s5815_s0 + %s5093_s30]]   ;;  %s5097_s20 = smov 11  }
   0xa   :  { %5819 = sst [smem:[#allocation28_spill]] %s5160_s17  ;;  %s5098_s26 = smov 12  }
   0xb   :  { %s5185_s8 = sld [smem:[%s5815_s0 + %s5094_s4]]   ;;  %s5099_s1 = smov 13  }
   0xc   :  { %s5190_s14 = sld [smem:[%s5815_s0 + %s5095_s10]]   ;;  %s5100_s7 = smov 14  }
   0xd   :  { %s5195_s19 = sld [smem:[%s5815_s0 + %s5096_s15]]   ;;  %s5101_s15 = smov 15  }
   0xe   :  { %s5200_s24 = sld [smem:[%s5815_s0 + %s5097_s20]]   ;;  %s5102_s22 = smov 16  }
   0xf   :  { %s5205_s30 = sld [smem:[%s5815_s0 + %s5098_s26]]   ;;  %s5103_s28 = smov 17  }
  0x10   :  { %s5210_s6 = sld [smem:[%s5815_s0 + %s5099_s1]]  }
  0x11   :  { %s5215_s12 = sld [smem:[%s5815_s0 + %s5100_s7]]   ;;  %s5104_s7 = smov 18  }
  0x12   :  { %5820 = sst [smem:[#allocation29_spill]] %s5190_s14 }
  0x13   :  { %s5220_s20 = sld [smem:[%s5815_s0 + %s5101_s15]]   ;;  %s5105_s15 = smov 19  }
  0x14   :  { %5821 = sst [smem:[#allocation30_spill]] %s5200_s24 }
  0x15   :  { %s5225_s27 = sld [smem:[%s5815_s0 + %s5102_s22]]   ;;  %s5106_s22 = smov 20  }
  0x16   :  { %5822 = sst [smem:[#allocation31_spill]] %s5210_s6 }
  0x17   :  { %5823 = sst [smem:[#allocation32_spill]] %s5215_s12 }
  0x18   :  { %s5230_s4 = sld [smem:[%s5815_s0 + %s5103_s28]]   ;;  %s5107_s28 = smov 21  }
  0x19   :  { %5824 = sst [smem:[#allocation33_spill]] %s5220_s20 }
  0x1a   :  { %s5235_s12 = sld [smem:[%s5815_s0 + %s5104_s7]]   ;;  %s5108_s7 = smov 22  }
  0x1b   :  { %s5240_s20 = sld [smem:[%s5815_s0 + %s5105_s15]]   ;;  %s5109_s15 = smov 23  }
  0x1c   :  { %s5245_s17 = sld [smem:[%s5815_s0 + %s5106_s22]]   ;;  %s5110_s22 = smov 24  }
  0x1d   :  { %s5255_s9 = sld [smem:[%s5815_s0 + %s5108_s7]]   ;;  %s5112_s7 = smov 26  }
  0x1e   :  { %5825 = sst [smem:[#allocation34_spill]] %s5230_s4 }
  0x1f   :  { %s5250_s4 = sld [smem:[%s5815_s0 + %s5107_s28]]   ;;  %s5111_s28 = smov 25  }
  0x20   :  { %s5265_s6 = sld [smem:[%s5815_s0 + %s5110_s22]]   ;;  %s5114_s22 = smov 28  }
  0x21   :  { %5826 = sst [smem:[#allocation35_spill]] %s5240_s20 }
  0x22   :  { %s5260_s20 = sld [smem:[%s5815_s0 + %s5109_s15]]   ;;  %s5113_s15 = smov 27  }
  0x23   :  { %s5275_s24 = sld [smem:[%s5815_s0 + %s5112_s7]]   ;;  %s5116_s7 = smov 30  }
  0x24   :  { %s5295_s14 = sld [smem:[%s5815_s0 + %s5116_s7]]  }
  0x25   :  { %5827 = sst [smem:[#allocation36_spill]] %s5250_s4 }
  0x26   :  { %5829 = sst [smem:[#allocation38_spill]] %s5265_s6 }
  0x27   :  { %s5270_s4 = sld [smem:[%s5815_s0 + %s5111_s28]]   ;;  %s5115_s28 = smov 29  }
  0x28   :  { %5828 = sst [smem:[#allocation37_spill]] %s5260_s20 }
  0x29   :  { %s5280_s20 = sld [smem:[%s5815_s0 + %s5113_s15]]  }
  0x2a   :  { %s5285_s6 = sld [smem:[%s5815_s0 + %s5114_s22]]  }
  0x2d   :  { %5830 = sst [smem:[#allocation39_spill]] %s5270_s4 }
  0x2e   :  { %s5290_s4 = sld [smem:[%s5815_s0 + %s5115_s28]]  }
  0x2f   :  { %66 = vsyncpa [#allocation3], 0 }
  0x30   :  { %67 = vsyncpa [#allocation6], 0 }
  0x31   :  { %68 = vsyncpa [#allocation9], 0 }
  0x32   :  { %69 = vsyncpa [#allocation12], 0 }
  0x33   :  { %70 = vsyncpa [#allocation15], 0 }
  0x34   :  { %71 = vsyncpa [#allocation18], 0 }
  0x35   :  { %72 = vsyncpa [#allocation4], 0  ;;  %s5117_s15 = smov [#allocation5]   ;;  %s5118_s18 = smov [#allocation8]  }
  0x36   :  { %s92_s16 = sshll.u32 %s5117_s15, 4  ;;  %s128_s22 = sshll.u32 %s5118_s18, 4  ;;  %s93_s16 = int_to_ptr.vmem [resolvable:$true] %s92_s16  ;;  %s129_s22 = int_to_ptr.vmem [resolvable:$true] %s128_s22 }
  0x37   :  { %s4861_s23 = scalar_lea.vmem %s93_s16, 256  ;;  %p4866_p1 = scmp.lt.s32.totalorder %s93_s16, %s93_s16 }
  0x38   :  { %p4862_p0 = scmp.ne.s32.totalorder %s93_s16, %s4861_s23  ;;  %p4867_p2 = scmp.lt.s32.totalorder %s4861_s23, %s4861_s23 }
  0x3a   :  { %p4868_p3 = por %p4867_p2, %p4866_p1 }
  0x3c   :  { %p4869_p4 = pnand %p4868_p3, %p4862_p0 }
  0x3e   :  { %4872 = shalt.err (!%p4869_p4)
}
  0x3f   :  { %s5119_s0 = smov 128   ;;  %s5120_s26 = smov 8  }
  0x40   :  { %98 = dma.hbm_to_vmem [thread:$0]  %s5155_s13, 256, %s93_s16, [#allocation6], %s5119_s0, %s5119_s0, %s5120_s26  }
  0x41   :  { %s4881_s28 = scalar_lea.vmem %s129_s22, 512  ;;  %p4886_p6 = scmp.lt.s32.totalorder %s129_s22, %s129_s22 }
  0x42   :  { %p4882_p5 = scmp.ne.s32.totalorder %s129_s22, %s4881_s28  ;;  %p4887_p7 = scmp.lt.s32.totalorder %s4881_s28, %s4881_s28 }
  0x44   :  { %p4888_p8 = por %p4887_p7, %p4886_p6 }
  0x46   :  { %p4889_p9 = pnand %p4888_p8, %p4882_p5 }
  0x48   :  { %4892 = shalt.err (!%p4889_p9)
}
  0x49   :  { %134 = dma.hbm_to_vmem [thread:$0]  %s5195_s19, 512, %s129_s22, [#allocation9], %s5119_s0, %s5119_s0, %s5120_s26  }
  0x4a   :  { %s5121_s1 = smov [#allocation11]   ;;  %s5122_s7 = smov [#allocation14]  }
  0x4b   :  { %s160_s2 = sshll.u32 %s5121_s1, 4  ;;  %s188_s10 = sshll.u32 %s5122_s7, 4  ;;  %s161_s2 = int_to_ptr.vmem [resolvable:$true] %s160_s2  ;;  %s189_s10 = int_to_ptr.vmem [resolvable:$true] %s188_s10 }
  0x4c   :  { %s4901_s11 = scalar_lea.vmem %s161_s2, 512  ;;  %p4906_p11 = scmp.lt.s32.totalorder %s161_s2, %s161_s2 }
  0x4d   :  { %p4902_p10 = scmp.ne.s32.totalorder %s161_s2, %s4901_s11  ;;  %p4907_p12 = scmp.lt.s32.totalorder %s4901_s11, %s4901_s11 }
  0x4f   :  { %p4908_p13 = por %p4907_p12, %p4906_p11 }
  0x51   :  { %p4909_p0 = pnand %p4908_p13, %p4902_p10 }
  0x53   :  { %4912 = shalt.err (!%p4909_p0)
}
  0x54   :  { %166 = dma.hbm_to_vmem [thread:$0]  %s5225_s27, 512, %s161_s2, [#allocation12], %s5119_s0, %s5119_s0, %s5120_s26  }
  0x55   :  { %s4921_s13 = scalar_lea.vmem %s189_s10, 512  ;;  %p4926_p2 = scmp.lt.s32.totalorder %s189_s10, %s189_s10 }
  0x56   :  { %p4922_p1 = scmp.ne.s32.totalorder %s189_s10, %s4921_s13  ;;  %p4927_p3 = scmp.lt.s32.totalorder %s4921_s13, %s4921_s13 }
  0x58   :  { %p4928_p4 = por %p4927_p3, %p4926_p2 }
  0x5a   :  { %p4929_p5 = pnand %p4928_p4, %p4922_p1 }
  0x5c   :  { %4932 = shalt.err (!%p4929_p5)
}
  0x5d   :  { %194 = dma.hbm_to_vmem [thread:$0]  %s5245_s17, 512, %s189_s10, [#allocation15], %s5119_s0, %s5119_s0, %s5120_s26  }
  0x5e   :  { %s5123_s19 = smov [#allocation2]   ;;  %s5124_s16 = smov [#allocation7]  }
  0x5f   :  { %s78_s15 = sshll.u32 %s5123_s19, 4  ;;  %s114_s18 = sshll.u32 %s5124_s16, 4  ;;  %s79_s15 = int_to_ptr.vmem [resolvable:$true] %s78_s15  ;;  %s115_s18 = int_to_ptr.vmem [resolvable:$true] %s114_s18 }
  0x60   :  { %s4941_s22 = scalar_lea.vmem %s79_s15, 256  ;;  %p4946_p7 = scmp.lt.s32.totalorder %s79_s15, %s79_s15 }
  0x61   :  { %p4942_p6 = scmp.ne.s32.totalorder %s79_s15, %s4941_s22  ;;  %p4947_p8 = scmp.lt.s32.totalorder %s4941_s22, %s4941_s22 }
  0x63   :  { %p4948_p9 = por %p4947_p8, %p4946_p7 }
  0x65   :  { %p4949_p10 = pnand %p4948_p9, %p4942_p6 }
  0x67   :  { %4952 = shalt.err (!%p4949_p10)
}
  0x68   :  { %84 = dma.hbm_to_vmem [thread:$0]  %s5145_s5, 256, %s79_s15, [#allocation3], %s5119_s0, %s5119_s0, %s5120_s26  }
  0x69   :  { %s4961_s27 = scalar_lea.vmem %s115_s18, 512  ;;  %p4966_p12 = scmp.lt.s32.totalorder %s115_s18, %s115_s18 }
  0x6a   :  { %p4962_p11 = scmp.ne.s32.totalorder %s115_s18, %s4961_s27  ;;  %p4967_p13 = scmp.lt.s32.totalorder %s4961_s27, %s4961_s27 }
  0x6c   :  { %p4968_p0 = por %p4967_p13, %p4966_p12 }
  0x6e   :  { %p4969_p1 = pnand %p4968_p0, %p4962_p11 }
  0x70   :  { %4972 = shalt.err (!%p4969_p1)
}
  0x71   :  { %120 = dma.hbm_to_vmem [thread:$0]  %s5185_s8, 512, %s115_s18, [#allocation6], %s5119_s0, %s5119_s0, %s5120_s26  }
  0x72   :  { %s5125_s17 = smov [#allocation10]   ;;  %s5126_s28 = smov [#allocation13]  }
  0x73   :  { %s142_s23 = sshll.u32 %s5125_s17, 4  ;;  %s174_s1 = sshll.u32 %s5126_s28, 4  ;;  %s143_s23 = int_to_ptr.vmem [resolvable:$true] %s142_s23  ;;  %s175_s1 = int_to_ptr.vmem [resolvable:$true] %s174_s1 }
  0x74   :  { %s4981_s2 = scalar_lea.vmem %s143_s23, 512  ;;  %p4986_p3 = scmp.lt.s32.totalorder %s143_s23, %s143_s23 }
  0x75   :  { %p4982_p2 = scmp.ne.s32.totalorder %s143_s23, %s4981_s2  ;;  %p4987_p4 = scmp.lt.s32.totalorder %s4981_s2, %s4981_s2 }
  0x77   :  { %p4988_p5 = por %p4987_p4, %p4986_p3 }
  0x79   :  { %p4989_p6 = pnand %p4988_p5, %p4982_p2 }
  0x7b   :  { %4992 = shalt.err (!%p4989_p6)
}
  0x7c   :  { %148 = dma.hbm_to_vmem [thread:$0]  %s5205_s30, 512, %s143_s23, [#allocation9], %s5119_s0, %s5119_s0, %s5120_s26  }
  0x7d   :  { %s5001_s5 = scalar_lea.vmem %s175_s1, 512  ;;  %p5006_p8 = scmp.lt.s32.totalorder %s175_s1, %s175_s1 }
  0x7e   :  { %p5002_p7 = scmp.ne.s32.totalorder %s175_s1, %s5001_s5  ;;  %p5007_p9 = scmp.lt.s32.totalorder %s5001_s5, %s5001_s5 }
  0x80   :  { %p5008_p10 = por %p5007_p9, %p5006_p8 }
  0x82   :  { %p5009_p11 = pnand %p5008_p10, %p5002_p7 }
  0x84   :  { %5012 = shalt.err (!%p5009_p11)
}
  0x85   :  { %180 = dma.hbm_to_vmem [thread:$0]  %s5235_s12, 512, %s175_s1, [#allocation12], %s5119_s0, %s5119_s0, %s5120_s26  }
  0x86   :  { %s5127_s8 = smov [#allocation16]   ;;  %s5128_s10 = smov [#allocation17]  }
  0x87   :  { %s202_s7 = sshll.u32 %s5127_s8, 4  ;;  %s220_s11 = sshll.u32 %s5128_s10, 4  ;;  %s203_s7 = int_to_ptr.vmem [resolvable:$true] %s202_s7  ;;  %s221_s11 = int_to_ptr.vmem [resolvable:$true] %s220_s11 }
  0x88   :  { %s5021_s13 = scalar_lea.vmem %s203_s7, 512  ;;  %p5026_p13 = scmp.lt.s32.totalorder %s203_s7, %s203_s7 }
  0x89   :  { %p5022_p12 = scmp.ne.s32.totalorder %s203_s7, %s5021_s13  ;;  %p5027_p0 = scmp.lt.s32.totalorder %s5021_s13, %s5021_s13 }
  0x8b   :  { %p5028_p1 = por %p5027_p0, %p5026_p13 }
  0x8d   :  { %p5029_p2 = pnand %p5028_p1, %p5022_p12 }
  0x8f   :  { %5032 = shalt.err (!%p5029_p2)
}
  0x90   :  { %208 = dma.hbm_to_vmem [thread:$0]  %s5255_s9, 512, %s203_s7, [#allocation15], %s5119_s0, %s5119_s0, %s5120_s26  }
  0x91   :  { %s5041_s30 = scalar_lea.vmem %s221_s11, 512  ;;  %p5046_p4 = scmp.lt.s32.totalorder %s221_s11, %s221_s11 }
  0x92   :  { %p5042_p3 = scmp.ne.s32.totalorder %s221_s11, %s5041_s30  ;;  %p5047_p5 = scmp.lt.s32.totalorder %s5041_s30, %s5041_s30 }
  0x94   :  { %p5048_p6 = por %p5047_p5, %p5046_p4 }
  0x96   :  { %p5049_p7 = pnand %p5048_p6, %p5042_p3 }
  0x98   :  { %5052 = shalt.err (!%p5049_p7)
}
  0x99   :  { %226 = dma.hbm_to_vmem [thread:$0]  %s5275_s24, 512, %s221_s11, [#allocation18], %s5119_s0, %s5119_s0, %s5120_s26  }
  0x9a   :  { %5073 = dma.done.wait [#allocation3], 256  }
  0x9b   :  { %5074 = vsyncadd [#allocation3], 4294967040 }
  0x9c   :  { %5075 = dma.done.wait [#allocation6], 768  }
  0x9d   :  { %5076 = vsyncadd [#allocation6], 4294966528 }
  0x9e   :  { %5077 = dma.done.wait [#allocation9], 1024  }
  0x9f   :  { %5078 = vsyncadd [#allocation9], 4294966272 }
  0xa0   :  { %5079 = dma.done.wait [#allocation12], 1024  }
  0xa1   :  { %5080 = vsyncadd [#allocation12], 4294966272 }
  0xa2   :  { %5081 = dma.done.wait [#allocation15], 1024  }
  0xa3   :  { %5082 = vsyncadd [#allocation15], 4294966272 }
  0xa4   :  { %5083 = dma.done.wait [#allocation18], 512  }
  0xa5   :  { %5084 = vsyncadd [#allocation18], 4294966784  ;;  %vm273_vm0 = vcmask 261120   ;;  %v5337_v0 = vld [vmem:[#allocation2] sm:$0xff]  ;;  %v5339_v1 = vld [vmem:[#allocation2 + $0x8] sm:$0xff]  ;;  %v5129_v46 = vmov 0.0  }
  0xa6   :  { %v274_v2 = vsel %vm273_vm0, %v5337_v0, 0.0  ;;  %v277_v3 = vsel %vm273_vm0, %v5339_v1, 0.0  ;;  %v332_v14 = vld [vmem:[#allocation8 + $0x18] sm:$0xff]  ;;  %v331_v16 = vld [vmem:[#allocation8 + $0x10] sm:$0xff]  ;;  %v330_v18 = vld [vmem:[#allocation8 + $0x8] sm:$0xff]  ;;  %s5831_s9 = sld [smem:[#allocation29_spill]] }
  0xa7   :  { %275 = vadd.xlane.f32.xlu0 %v274_v2  ;;  %v322_v15 = vld [vmem:[%s5175_s29 + $0x18] sm:$0xff]  ;;  %4433 = vmatprep.subr.mxu0 %v332_v14  ;;  %v321_v17 = vld [vmem:[%s5175_s29 + $0x10] sm:$0xff]  ;;  %v320_v19 = vld [vmem:[%s5175_s29 + $0x8] sm:$0xff]  ;;  %vm5130_vm1 = vmmov 0   ;;  %vm642_vm2 = vcmask 64512   ;;  %s5134_s24 = smov 16  }
  0xa8   :  { %4411 = vmatprep.subr.mxu1 %v322_v15  ;;  %4434 = vmatpush3.msra.mxu0 %v332_v14  ;;  %v329_v20 = vld [vmem:[#allocation8] sm:$0xff]  ;;  %v327_v22 = vld [vmem:[#allocation7 + $0x18] sm:$0xff]  ;;  %v5355_v35 = vld [vmem:[#allocation5] sm:$0xff]  ;;  %s5135_s12 = smov 24   ;;  %s5833_s19 = sld [smem:[#allocation31_spill]]  ;;  %vm1933_vm3 = vcmask 130048  }
  0xa9   :  { %4412 = vmatpush3.msra.mxu1 %v322_v15  ;;  %4435 = vmatprep.subr.mxu0 %v331_v16  ;;  %v319_v21 = vld [vmem:[%s5175_s29] sm:$0xff]  ;;  %v5359_v40 = vld [vmem:[#allocation5 + $0x8] sm:$0xff]  ;;  %v326_v43 = vld [vmem:[#allocation7 + $0x10] sm:$0xff]  ;;  %s5133_s29 = smov 104   ;;  %vm1936_vm4 = vcmask 195584   ;;  %s5834_s15 = sld [smem:[#allocation27_spill]] }
  0xaa   :  { %4413 = vmatprep.subr.mxu1 %v321_v17  ;;  %4436 = vmatpush3.msra.mxu0 %v331_v16  ;;  %v4167_v30 = vld [vmem:[%s5165_s21] ss:$0 sm:$0xff]  ;;  %v325_v44 = vld [vmem:[#allocation7 + $0x8] sm:$0xff]  ;;  %s5131_s21 = smov 120   ;;  %s5835_s16 = sld [smem:[#allocation28_spill]]  ;;  %vm4029_vm5 = vcmask 523264  }
  0xab   :  { %278 = vadd.xlane.f32.xlu0 %v277_v3  ;;  %4414 = vmatpush3.msra.mxu1 %v321_v17  ;;  %v4168_v32 = vld [vmem:[%s5170_s25] ss:$0 sm:$0xff]  ;;  %s5132_s25 = smov 112   ;;  %s5836_s18 = sld [smem:[#allocation35_spill]] }
  0xac   :  { %4437 = vmatprep.subr.mxu0 %v330_v18  ;;  %4415 = vmatprep.subr.mxu1 %v320_v19  ;;  %v324_v45 = vld [vmem:[#allocation7] sm:$0xff]  ;;  %s5837_s22 = sld [smem:[#allocation32_spill]]  ;;  %s5136_s5 = smov [#allocation19]  }
  0xad   :  { %4438 = vmatpush3.msra.mxu0 %v330_v18  ;;  %4416 = vmatpush3.msra.mxu1 %v320_v19  ;;  %v4169_v47 = vld [vmem:[%s5180_s3] ss:$0 sm:$0xff]  ;;  %s5832_s3 = sld [smem:[#allocation30_spill]] }
  0xae   :  { %4439 = vmatprep.subr.mxu0 %v329_v20  ;;  %4417 = vmatprep.subr.mxu1 %v319_v21  ;;  %v4172_v53 = vld [vmem:[%s5831_s9] ss:$0 sm:$0xff]  ;;  %s5838_s27 = sld [smem:[#allocation33_spill]] }
  0xaf   :  { %4440 = vmatpush3.msra.mxu0 %v329_v20  ;;  %4418 = vmatpush3.msra.mxu1 %v319_v21  ;;  %s5839_s17 = sld [smem:[#allocation34_spill]] }
  0xb0   :  { %4422 = vmatprep.subr.mxu1 %v327_v22  ;;  %4454 = vmatprep.subr.mxu0 %v5129_v46  ;;  %s5840_s23 = sld [smem:[#allocation36_spill]] }
  0xb1   :  { %s5841_s28 = sld [smem:[#allocation37_spill]] }
  0xb2   :  { %s5842_s1 = sld [smem:[#allocation38_spill]] }
  0xb3   :  { %s5843_s2 = sld [smem:[#allocation39_spill]] }
 0x130   :  { %v276_v4 = vpop.xlane.xlu0 %275 }
 0x131   :  { %v281_v5 = vmul.f32 0.03125, %v276_v4 }
 0x133   :  { %v283_v6 = vsub.f32 %v5337_v0, %v281_v5 }
 0x134   :  { %v279_v7 = vpop.xlane.xlu0 %278 }
 0x135   :  { %v282_v8 = vmul.f32 0.03125, %v279_v7  ;;  %v285_v9 = vmul.f32 %v283_v6, %v283_v6  ;;  %v4175_v7 = vld [vmem:[%s5832_s3] ss:$0 sm:$0xff] }
 0x137   :  { %v284_v10 = vsub.f32 %v5339_v1, %v282_v8  ;;  %v287_v11 = vsel %vm273_vm0, %v285_v9, 0.0 }
 0x138   :  { %288 = vadd.xlane.f32.xlu1 %v287_v11 }
 0x139   :  { %v286_v12 = vmul.f32 %v284_v10, %v284_v10 }
 0x13b   :  { %v290_v13 = vsel %vm273_vm0, %v286_v12, 0.0 }
 0x13c   :  { %291 = vadd.xlane.f32.xlu1 %v290_v13 }
 0x1c1   :  { %v289_v23 = vpop.xlane.xlu1 %288 }
 0x1c2   :  { %v293_v24 = vmul.f32 0.03125, %v289_v23 }
 0x1c4   :  { %v295_v25 = vadd.f32 1e-05, %v293_v24 }
 0x1c5   :  { %v292_v26 = vpop.xlane.xlu1 %291 }
 0x1c6   :  { %4777 = vrsqrt.f32 %v295_v25  ;;  %v294_v27 = vmul.f32 0.03125, %v292_v26 }
 0x1c8   :  { %v296_v28 = vadd.f32 1e-05, %v294_v27 }
 0x1ca   :  { %4779 = vrsqrt.f32 %v296_v28 }
 0x1d3   :  { %v4778_v29 = vpop.eup %4777 }
 0x1d4   :  { %v299_v31 = vmul.f32 %v4778_v29, %v283_v6 }
 0x1d6   :  { %v307_v33 = vmul.f32 %v4167_v30, %v299_v31 }
 0x1d7   :  { %v4780_v34 = vpop.eup %4779 }
 0x1d8   :  { %v300_v36 = vmul.f32 %v4780_v34, %v284_v10  ;;  %v315_v37 = vadd.f32 %v4168_v32, %v307_v33 }
 0x1da   :  { %v308_v38 = vmul.f32 %v4167_v30, %v300_v36  ;;  %4441 = vmatprep.mubr.msk.f32.mxu0 %vm273_vm0, %v315_v37  ;;  %v317_v39 = vadd.f32 %v315_v37, %v5355_v35 }
 0x1dc   :  { %v316_v41 = vadd.f32 %v4168_v32, %v308_v38  ;;  %4419 = vmatprep.mubr.msk.f32.mxu1 %vm273_vm0, %v317_v39 }
 0x1de   :  { %v318_v42 = vadd.f32 %v316_v41, %v5359_v40  ;;  %4442 = vmatmul.mubr.msk.f32.vlgmr.msra.gmra.mxu0 %vm273_vm0, %v316_v41 }
 0x1df   :  { %4456 = vmatprep.mubr.msk.f32.mxu0 %vm5130_vm1, %v5129_v46 }
 0x1e0   :  { %4420 = vmatmul.mubr.msk.f32.vlgmr.msra.gmra.mxu1 %vm273_vm0, %v318_v42 }
 0x1e1   :  { %4423 = vmatpush3.msra.mxu1 %v327_v22  ;;  %4430 = vmatprep.mubr.msk.f32.mxu1 %vm273_vm0, %v317_v39 }
 0x1e2   :  { %4424 = vmatprep.subr.mxu1 %v326_v43 }
 0x1e3   :  { %4425 = vmatpush3.msra.mxu1 %v326_v43 }
 0x1e4   :  { %4426 = vmatprep.subr.mxu1 %v325_v44 }
 0x1e5   :  { %4427 = vmatpush3.msra.mxu1 %v325_v44 }
 0x1e6   :  { %4428 = vmatprep.subr.mxu1 %v324_v45 }
 0x1e7   :  { %4429 = vmatpush3.msra.mxu1 %v324_v45 }
 0x1e8   :  { %4431 = vmatmul.mubr.msk.f32.vlgmr.msra.gmra.mxu1 %vm273_vm0, %v318_v42  ;;  %4444 = vmatprep.subr.mxu1 %v5129_v46 }
 0x1e9   :  { %4446 = vmatprep.mubr.msk.f32.mxu1 %vm5130_vm1, %v5129_v46 }
 0x29e   :  { %v4443_v2 = vpop.f32.mrf.mxu0 }
 0x29f   :  { %v5425_v10 = vadd.f32 %v4443_v2, %v4175_v7 }
 0x2a0   :  { %v4421_v48 = vpop.f32.mrf.mxu1  ;;  %v585_v5 = vpop.f32.mrf.mxu0 }
 0x2a1   :  { %v423_v49 = vadd.f32 %v4421_v48, %v4169_v47  ;;  %v5421_v8 = vadd.f32 %v4175_v7, %v585_v5 }
 0x2a2   :  { %v417_v50 = vpop.f32.mrf.mxu1 }
 0x2a3   :  { %v418_v51 = vadd.f32 %v4169_v47, %v417_v50  ;;  %598 = vrot.lane.b32.xlu1 %v423_v49, %s5131_s21 }
 0x2a5   :  { %600 = vrot.lane.b32.xlu0 %v418_v51, %s5132_s25 }
 0x2a7   :  { %602 = vrot.lane.b32.xlu1 %v423_v49, %s5132_s25 }
 0x2a8   :  { %v4432_v52 = vpop.f32.mrf.mxu1 }
 0x2a9   :  { %v504_v56 = vadd.f32 %v4432_v52, %v4172_v53 }
 0x2aa   :  { %v498_v54 = vpop.f32.mrf.mxu1 }
 0x2ab   :  { %v499_v55 = vadd.f32 %v4172_v53, %v498_v54  ;;  %596 = vrot.lane.b32.xlu1 %v418_v51, %s5131_s21 }
 0x2ad   :  { %4445 = vmatpush3.xpose.msk.msra.mxu1 %vm642_vm2, %v499_v55  ;;  %610 = vrot.lane.b32.xlu0 %v499_v55, %s5131_s21 }
 0x2ae   :  { %4449 = vmatprep.subr.mxu1 %v5129_v46 }
 0x2af   :  { %612 = vrot.lane.b32.xlu1 %v504_v56, %s5131_s21 }
 0x2b0   :  { %4447 = vmatmul.mubr.msk.f32.vlgmr.msra.gmra.mxu1 %vm642_vm2, %v418_v51 }
 0x2b1   :  { %614 = vrot.lane.b32.xlu0 %v499_v55, %s5132_s25  ;;  %4450 = vmatpush3.xpose.msk.msra.mxu1 %vm642_vm2, %v504_v56 }
 0x2b2   :  { %4451 = vmatprep.mubr.msk.f32.mxu1 %vm5130_vm1, %v5129_v46  ;;  %4459 = vmatprep.subr.mxu1 %v5129_v46 }
 0x2b3   :  { %616 = vrot.lane.b32.xlu1 %v504_v56, %s5132_s25 }
 0x2b4   :  { %4452 = vmatmul.mubr.msk.f32.vlgmr.msra.gmra.mxu1 %vm642_vm2, %v423_v49 }
 0x2b5   :  { %618 = vrot.lane.b32.xlu0 %v499_v55, %s5133_s29  ;;  %4461 = vmatprep.mubr.msk.f32.mxu1 %vm5130_vm1, %v5129_v46 }
 0x2b7   :  { %620 = vrot.lane.b32.xlu1 %v504_v56, %s5133_s29 }
 0x2b9   :  { %604 = vrot.lane.b32.xlu0 %v418_v51, %s5133_s29 }
 0x2bb   :  { %606 = vrot.lane.b32.xlu1 %v423_v49, %s5133_s29 }
 0x315   :  { %v599_v57 = vpop.permute.xlu1 %598 }
 0x317   :  { %v601_v59 = vpop.permute.xlu0 %600 }
 0x319   :  { %v603_v58 = vpop.permute.xlu1 %602 }
 0x31d   :  { %v597_v60 = vpop.permute.xlu1 %596 }
 0x31f   :  { %v611_v61 = vpop.permute.xlu0 %610 }
 0x320   :  { %4455 = vmatpush3.xpose.msk.msra.mxu0 %vm642_vm2, %v611_v61 }
 0x321   :  { %v613_v62 = vpop.permute.xlu1 %612  ;;  %4464 = vmatprep.subr.mxu0 %v5129_v46 }
 0x322   :  { %4460 = vmatpush3.xpose.msk.msra.mxu1 %vm642_vm2, %v613_v62 }
 0x323   :  { %v615_v63 = vpop.permute.xlu0 %614  ;;  %4457 = vmatmul.mubr.msk.f32.vlgmr.msra.gmra.mxu0 %vm642_vm2, %v597_v60  ;;  %4469 = vmatprep.subr.mxu1 %v5129_v46 }
 0x324   :  { %4465 = vmatpush3.xpose.msk.msra.mxu0 %vm642_vm2, %v615_v63  ;;  %4466 = vmatprep.mubr.msk.f32.mxu0 %vm5130_vm1, %v5129_v46 }
 0x325   :  { %v617_v3 = vpop.permute.xlu1 %616  ;;  %4462 = vmatmul.mubr.msk.f32.vlgmr.msra.gmra.mxu1 %vm642_vm2, %v599_v57  ;;  %4474 = vmatprep.subr.mxu0 %v5129_v46 }
 0x326   :  { %4470 = vmatpush3.xpose.msk.msra.mxu1 %vm642_vm2, %v617_v3  ;;  %4471 = vmatprep.mubr.msk.f32.mxu1 %vm5130_vm1, %v5129_v46 }
 0x327   :  { %v619_v4 = vpop.permute.xlu0 %618  ;;  %4467 = vmatmul.mubr.msk.f32.vlgmr.msra.gmra.mxu0 %vm642_vm2, %v601_v59  ;;  %4479 = vmatprep.subr.mxu1 %v5129_v46 }
 0x328   :  { %4475 = vmatpush3.xpose.msk.msra.mxu0 %vm642_vm2, %v619_v4  ;;  %4476 = vmatprep.mubr.msk.f32.mxu0 %vm5130_vm1, %v5129_v46 }
 0x329   :  { %v621_v6 = vpop.permute.xlu1 %620  ;;  %4472 = vmatmul.mubr.msk.f32.vlgmr.msra.gmra.mxu1 %vm642_vm2, %v603_v58  ;;  %4484 = vmatprep.subr.mxu0 %v5129_v46 }
 0x32a   :  { %4480 = vmatpush3.xpose.msk.msra.mxu1 %vm642_vm2, %v621_v6  ;;  %4481 = vmatprep.mubr.msk.f32.mxu1 %vm5130_vm1, %v5129_v46 }
 0x32b   :  { %v605_v9 = vpop.permute.xlu0 %604  ;;  %4489 = vmatprep.subr.mxu1 %v5129_v46 }
 0x32c   :  { %4477 = vmatmul.mubr.msk.f32.vlgmr.msra.gmra.mxu0 %vm642_vm2, %v605_v9 }
 0x32d   :  { %4485 = vmatpush3.msra.mxu0 %v5421_v8  ;;  %v607_v11 = vpop.permute.xlu1 %606  ;;  %4486 = vmatprep.mubr.msk.f32.mxu0 %vm5130_vm1, %v5129_v46 }
 0x32e   :  { %4482 = vmatmul.mubr.msk.f32.vlgmr.msra.gmra.mxu1 %vm642_vm2, %v607_v11  ;;  %4494 = vmatprep.subr.mxu0 %v5129_v46 }
 0x32f   :  { %4490 = vmatpush3.msra.mxu1 %v5425_v10  ;;  %4491 = vmatprep.mubr.msk.f32.mxu1 %vm5130_vm1, %v5129_v46 }
 0x330   :  { %4499 = vmatprep.subr.mxu1 %v5129_v46 }
 0x370   :  { %v713_v12 = vpop.f32.mrf.mxu1 }
 0x371   :  { %v1235_v13 = vsel %vm642_vm2, %v713_v12, -inf }
 0x372   :  { %1236 = vmax.xlane.f32.xlu0 %v1235_v13  ;;  %v4448_v14 = vpop.f32.mrf.mxu1 }
 0x374   :  { %v787_v15 = vpop.f32.mrf.mxu1 }
 0x375   :  { %v1238_v16 = vsel %vm642_vm2, %v787_v15, -inf }
 0x376   :  { %1239 = vmax.xlane.f32.xlu1 %v1238_v16  ;;  %v4453_v17 = vpop.f32.mrf.mxu1 }
 0x3e3   :  { %v861_v18 = vpop.f32.mrf.mxu0 }
 0x3e4   :  { %v1241_v26 = vsel %vm642_vm2, %v861_v18, -inf }
 0x3e5   :  { %v4458_v19 = vpop.f32.mrf.mxu0  ;;  %v935_v20 = vpop.f32.mrf.mxu1 }
 0x3e6   :  { %v1244_v21 = vsel %vm642_vm2, %v935_v20, -inf }
 0x3e7   :  { %v1009_v22 = vpop.f32.mrf.mxu0  ;;  %1245 = vmax.xlane.f32.xlu0 %v1244_v21  ;;  %v4463_v23 = vpop.f32.mrf.mxu1 }
 0x3e8   :  { %v1247_v32 = vsel %vm642_vm2, %v1009_v22, -inf }
 0x3e9   :  { %v4468_v24 = vpop.f32.mrf.mxu0  ;;  %v1083_v25 = vpop.f32.mrf.mxu1 }
 0x3ea   :  { %v1250_v27 = vsel %vm642_vm2, %v1083_v25, -inf }
 0x3eb   :  { %1242 = vmax.xlane.f32.xlu0 %v1241_v26  ;;  %1251 = vmax.xlane.f32.xlu1 %v1250_v27  ;;  %v4473_v28 = vpop.f32.mrf.mxu1 }
 0x3ec   :  { %v1157_v29 = vpop.f32.mrf.mxu0 }
 0x3ed   :  { %v1253_v36 = vsel %vm642_vm2, %v1157_v29, -inf }
 0x3ee   :  { %v4478_v30 = vpop.f32.mrf.mxu0  ;;  %v1231_v31 = vpop.f32.mrf.mxu1 }
 0x3ef   :  { %1248 = vmax.xlane.f32.xlu0 %v1247_v32  ;;  %v1256_v33 = vsel %vm642_vm2, %v1231_v31, -inf }
 0x3f0   :  { %1257 = vmax.xlane.f32.xlu1 %v1256_v33  ;;  %v4483_v34 = vpop.f32.mrf.mxu1 }
 0x3f3   :  { %1254 = vmax.xlane.f32.xlu0 %v1253_v36 }
 0x3fb   :  { %v1237_v37 = vpop.xlane.xlu0 %1236 }
 0x3fc   :  { %v1259_v38 = vsub.f32 %v713_v12, %v1237_v37 }
 0x3fe   :  { %v1267_v41 = vmul.f32 1.442695, %v1259_v38 }
 0x3ff   :  { %v1240_v39 = vpop.xlane.xlu1 %1239 }
 0x400   :  { %v1260_v42 = vsub.f32 %v787_v15, %v1240_v39  ;;  %4781 = vpow2.f32 %v1267_v41 }
 0x401   :  { %626 = vrot.lane.b32.xlu1 %v5425_v10, %s5131_s21 }
 0x402   :  { %v1269_v43 = vmul.f32 1.442695, %v1260_v42 }
 0x404   :  { %4783 = vpow2.f32 %v1269_v43 }
 0x405   :  { %630 = vrot.lane.b32.xlu1 %v5421_v8, %s5132_s25 }
 0x409   :  { %624 = vrot.lane.b32.xlu0 %v5421_v8, %s5131_s21  ;;  %632 = vrot.lane.b32.xlu1 %v5425_v10, %s5132_s25 }
 0x40d   :  { %v4782_v44 = vpop.eup %4781 }
 0x40e   :  { %v1283_v45 = vsel %vm642_vm2, %v4782_v44, 0.0 }
 0x411   :  { %v4784_v47 = vpop.eup %4783 }
 0x412   :  { %v1286_v48 = vsel %vm642_vm2, %v4784_v47, 0.0 }
 0x428   :  { %1284 = vadd.xlane.f32.xlu0 %v1283_v45 }
 0x42d   :  { %1287 = vadd.xlane.f32.xlu1 %v1286_v48 }
 0x470   :  { %v1246_v49 = vpop.xlane.xlu0 %1245 }
 0x471   :  { %v1262_v50 = vsub.f32 %v935_v20, %v1246_v49 }
 0x473   :  { %v1273_v51 = vmul.f32 1.442695, %v1262_v50 }
 0x474   :  { %v1243_v52 = vpop.xlane.xlu0 %1242  ;;  %v1252_v53 = vpop.xlane.xlu1 %1251 }
 0x475   :  { %4785 = vpow2.f32 %v1273_v51  ;;  %v1261_v54 = vsub.f32 %v861_v18, %v1243_v52  ;;  %v1264_v55 = vsub.f32 %v1083_v25, %v1252_v53 }
 0x477   :  { %v1271_v56 = vmul.f32 1.442695, %v1261_v54  ;;  %v1277_v57 = vmul.f32 1.442695, %v1264_v55  ;;  %v337_v54 = vld [vmem:[#allocation10 + $0x18] sm:$0xff]  ;;  %v336_v55 = vld [vmem:[#allocation10 + $0x10] sm:$0xff] }
 0x478   :  { %v1249_v58 = vpop.xlane.xlu0 %1248 }
 0x479   :  { %4787 = vpow2.f32 %v1271_v56  ;;  %v1263_v59 = vsub.f32 %v1009_v22, %v1249_v58  ;;  %v1258_v60 = vpop.xlane.xlu1 %1257  ;;  %v335_v56 = vld [vmem:[#allocation10 + $0x8] sm:$0xff]  ;;  %v334_v58 = vld [vmem:[#allocation10] sm:$0xff] }
 0x47a   :  { %4789 = vpow2.f32 %v1277_v57  ;;  %v1266_v61 = vsub.f32 %v1231_v31, %v1258_v60 }
 0x47b   :  { %v1275_v62 = vmul.f32 1.442695, %v1263_v59 }
 0x47c   :  { %v1281_v63 = vmul.f32 1.442695, %v1266_v61  ;;  %v1255_v2 = vpop.xlane.xlu0 %1254 }
 0x47d   :  { %4791 = vpow2.f32 %v1275_v62  ;;  %v1265_v3 = vsub.f32 %v1157_v29, %v1255_v2  ;;  %v627_v19 = vpop.permute.xlu1 %626 }
 0x47e   :  { %4793 = vpow2.f32 %v1281_v63 }
 0x47f   :  { %v1279_v4 = vmul.f32 1.442695, %v1265_v3 }
 0x480   :  { %v625_v21 = vpop.permute.xlu0 %624 }
 0x481   :  { %4795 = vpow2.f32 %v1279_v4  ;;  %v631_v20 = vpop.permute.xlu1 %630 }
 0x482   :  { %v4786_v5 = vpop.eup %4785 }
 0x483   :  { %v1292_v6 = vsel %vm642_vm2, %v4786_v5, 0.0 }
 0x484   :  { %1293 = vadd.xlane.f32.xlu1 %v1292_v6 }
 0x485   :  { %v633_v23 = vpop.permute.xlu1 %632 }
 0x486   :  { %v4788_v7 = vpop.eup %4787 }
 0x487   :  { %v4790_v9 = vpop.eup %4789  ;;  %v1289_v11 = vsel %vm642_vm2, %v4788_v7, 0.0 }
 0x488   :  { %1290 = vadd.xlane.f32.xlu0 %v1289_v11  ;;  %v1298_v12 = vsel %vm642_vm2, %v4790_v9, 0.0 }
 0x489   :  { %1299 = vadd.xlane.f32.xlu1 %v1298_v12 }
 0x48a   :  { %v4792_v13 = vpop.eup %4791 }
 0x48b   :  { %v5457_v14 = vpop.eup %4793  ;;  %v1295_v15 = vsel %vm642_vm2, %v4792_v13, 0.0 }
 0x48c   :  { %1296 = vadd.xlane.f32.xlu0 %v1295_v15  ;;  %v1304_v16 = vsel %vm642_vm2, %v5457_v14, 0.0 }
 0x48d   :  { %1305 = vadd.xlane.f32.xlu1 %v1304_v16 }
 0x48e   :  { %v5462_v17 = vpop.eup %4795 }
 0x48f   :  { %v1301_v18 = vsel %vm642_vm2, %v5462_v17, 0.0 }
 0x490   :  { %1302 = vadd.xlane.f32.xlu0 %v1301_v18 }
 0x49e   :  { %638 = vrot.lane.b32.xlu1 %v5425_v10, %s5133_s29 }
 0x4a6   :  { %636 = vrot.lane.b32.xlu0 %v5421_v8, %s5133_s29 }
 0x4b1   :  { %v1285_v22 = vpop.xlane.xlu0 %1284 }
 0x4b2   :  { %4797 = vrcp.f32 %v1285_v22  ;;  %v4202_v22 = vld [vmem:[%s5833_s19] ss:$0 sm:$0xff] }
 0x4b6   :  { %v1288_v24 = vpop.xlane.xlu1 %1287 }
 0x4b7   :  { %4799 = vrcp.f32 %v1288_v24 }
 0x4bf   :  { %v4798_v25 = vpop.eup %4797 }
 0x4c0   :  { %v1315_v26 = vmul.f32 %v4798_v25, %v4782_v44 }
 0x4c2   :  { %4487 = vmatmul.mubr.msk.f32.vlgmr.msra.gmra.mxu0 %vm642_vm2, %v1315_v26 }
 0x4c3   :  { %4495 = vmatpush3.msra.mxu0 %v625_v21  ;;  %4496 = vmatprep.mubr.msk.f32.mxu0 %vm5130_vm1, %v5129_v46 }
 0x4c4   :  { %v4800_v10 = vpop.eup %4799  ;;  %4504 = vmatprep.subr.mxu0 %v5129_v46 }
 0x4c5   :  { %v1316_v27 = vmul.f32 %v4800_v10, %v4784_v47 }
 0x4c7   :  { %4492 = vmatmul.mubr.msk.f32.vlgmr.msra.gmra.mxu1 %vm642_vm2, %v1316_v27 }
 0x4c8   :  { %4500 = vmatpush3.msra.mxu1 %v627_v19  ;;  %4501 = vmatprep.mubr.msk.f32.mxu1 %vm5130_vm1, %v5129_v46 }
 0x4c9   :  { %4509 = vmatprep.subr.mxu1 %v5129_v46 }
 0x50d   :  { %v1294_v8 = vpop.xlane.xlu1 %1293 }
 0x50e   :  { %4801 = vrcp.f32 %v1294_v8 }
 0x511   :  { %v1291_v28 = vpop.xlane.xlu0 %1290 }
 0x512   :  { %4803 = vrcp.f32 %v1291_v28  ;;  %v1300_v29 = vpop.xlane.xlu1 %1299 }
 0x513   :  { %4805 = vrcp.f32 %v1300_v29  ;;  %v2090_v29 = vld [vmem:[#allocation13 + $0x18] sm:$0xff] }
 0x515   :  { %v1297_v30 = vpop.xlane.xlu0 %1296 }
 0x516   :  { %4807 = vrcp.f32 %v1297_v30  ;;  %v1306_v31 = vpop.xlane.xlu1 %1305  ;;  %v2089_v30 = vld [vmem:[#allocation13 + $0x10] sm:$0xff] }
 0x517   :  { %4809 = vrcp.f32 %v1306_v31  ;;  %v2074_v31 = vld [vmem:[%s5835_s16] sm:$0xff] }
 0x519   :  { %v1303_v32 = vpop.xlane.xlu0 %1302 }
 0x51a   :  { %4811 = vrcp.f32 %v1303_v32  ;;  %v639_v42 = vpop.permute.xlu1 %638 }
 0x51b   :  { %v4802_v33 = vpop.eup %4801 }
 0x51c   :  { %v1318_v34 = vmul.f32 %v4802_v33, %v4786_v5  ;;  %v5527_v33 = vld [vmem:[%s5834_s15 + $0x8] sm:$0xff] }
 0x51d   :  { %v637_v47 = vpop.permute.xlu0 %636 }
 0x51e   :  { %4502 = vmatmul.mubr.msk.f32.vlgmr.msra.gmra.mxu1 %vm642_vm2, %v1318_v34  ;;  %v2075_v34 = vld [vmem:[%s5835_s16 + $0x8] sm:$0xff] }
 0x51f   :  { %v4804_v36 = vpop.eup %4803  ;;  %4510 = vmatpush3.msra.mxu1 %v633_v23  ;;  %4511 = vmatprep.mubr.msk.f32.mxu1 %vm5130_vm1, %v5129_v46 }
 0x520   :  { %v4806_v37 = vpop.eup %4805  ;;  %4519 = vmatprep.subr.mxu1 %v5129_v46  ;;  %v1317_v38 = vmul.f32 %v4804_v36, %v4788_v7  ;;  %v5531_v36 = vld [vmem:[%s5834_s15 + $0x10] sm:$0xff] }
 0x521   :  { %v1320_v39 = vmul.f32 %v4806_v37, %v4790_v9  ;;  %v2076_v37 = vld [vmem:[%s5835_s16 + $0x10] sm:$0xff] }
 0x522   :  { %4497 = vmatmul.mubr.msk.f32.vlgmr.msra.gmra.mxu0 %vm642_vm2, %v1317_v38  ;;  %v2087_v38 = vld [vmem:[#allocation13] sm:$0xff] }
 0x523   :  { %v4808_v41 = vpop.eup %4807  ;;  %4505 = vmatpush3.msra.mxu0 %v631_v20  ;;  %4512 = vmatmul.mubr.msk.f32.vlgmr.msra.gmra.mxu1 %vm642_vm2, %v1320_v39  ;;  %v2079_v39 = vadd.f32 %v2075_v34, %v5527_v33 }
 0x524   :  { %v4810_v43 = vpop.eup %4809  ;;  %4520 = vmatpush3.msra.mxu1 %v639_v42  ;;  %4506 = vmatprep.mubr.msk.f32.mxu0 %vm5130_vm1, %v5129_v46  ;;  %v1319_v44 = vmul.f32 %v4808_v41, %v4792_v13  ;;  %v2080_v41 = vadd.f32 %v2076_v37, %v5531_v36  ;;  %v5538_v42 = vld [vmem:[%s5834_s15 + $0x18] sm:$0xff] }
 0x525   :  { %4514 = vmatprep.subr.mxu0 %v5129_v46  ;;  %4521 = vmatprep.mubr.msk.f32.mxu1 %vm5130_vm1, %v5129_v46  ;;  %v1322_v45 = vmul.f32 %v4810_v43, %v5457_v14  ;;  %v2077_v43 = vld [vmem:[%s5835_s16 + $0x18] sm:$0xff] }
 0x526   :  { %4507 = vmatmul.mubr.msk.f32.vlgmr.msra.gmra.mxu0 %vm642_vm2, %v1319_v44  ;;  %v2081_v44 = vadd.f32 %v2077_v43, %v5538_v42 }
 0x527   :  { %v4812_v48 = vpop.eup %4811  ;;  %4515 = vmatpush3.msra.mxu0 %v637_v47  ;;  %4522 = vmatmul.mubr.msk.f32.vlgmr.msra.gmra.mxu1 %vm642_vm2, %v1322_v45 }
 0x528   :  { %4516 = vmatprep.mubr.msk.f32.mxu0 %vm5130_vm1, %v5129_v46  ;;  %v1321_v49 = vmul.f32 %v4812_v48, %v5462_v17  ;;  %4524 = vmatprep.subr.mxu0 %v337_v54 }
 0x52a   :  { %4517 = vmatmul.mubr.msk.f32.vlgmr.msra.gmra.mxu0 %vm642_vm2, %v1321_v49 }
 0x52b   :  { %4525 = vmatpush3.msra.mxu0 %v337_v54 }
 0x52c   :  { %4526 = vmatprep.subr.mxu0 %v336_v55 }
 0x52d   :  { %4527 = vmatpush3.msra.mxu0 %v336_v55 }
 0x52e   :  { %4528 = vmatprep.subr.mxu0 %v335_v56 }
 0x52f   :  { %4529 = vmatpush3.msra.mxu0 %v335_v56  ;;  %v2085_v56 = vld [vmem:[#allocation11 + $0x18] sm:$0xff] }
 0x530   :  { %4530 = vmatprep.subr.mxu0 %v334_v58  ;;  %4535 = vmatprep.subr.mxu1 %v2085_v56 }
 0x531   :  { %4531 = vmatpush3.msra.mxu0 %v334_v58  ;;  %4536 = vmatpush3.msra.mxu1 %v2085_v56  ;;  %v2083_v58 = vld [vmem:[#allocation11 + $0x8] sm:$0xff] }
 0x532   :  { %4546 = vmatprep.subr.mxu0 %v2090_v29 }
 0x582   :  { %v1392_v50 = vpop.f32.mrf.mxu0 }
 0x584   :  { %v4488_v51 = vpop.f32.mrf.mxu0 }
 0x587   :  { %v1465_v52 = vpop.f32.mrf.mxu1 }
 0x589   :  { %v4493_v53 = vpop.f32.mrf.mxu1 }
 0x5de   :  { %v1611_v57 = vpop.f32.mrf.mxu1 }
 0x5df   :  { %1911 = vrot.lane.b32.xlu1 %v1611_v57, %s5120_s26  ;;  %v2084_v57 = vld [vmem:[#allocation11 + $0x10] sm:$0xff] }
 0x5e0   :  { %v4503_v59 = vpop.f32.mrf.mxu1  ;;  %4537 = vmatprep.subr.mxu1 %v2084_v57 }
 0x5e1   :  { %4538 = vmatpush3.msra.mxu1 %v2084_v57  ;;  %v2082_v59 = vld [vmem:[#allocation11] sm:$0xff] }
 0x5e2   :  { %v1538_v60 = vpop.f32.mrf.mxu0  ;;  %4539 = vmatprep.subr.mxu1 %v2083_v58 }
 0x5e3   :  { %v1757_v61 = vpop.f32.mrf.mxu1  ;;  %1909 = vrot.lane.b32.xlu0 %v1538_v60, %s5120_s26  ;;  %4540 = vmatpush3.msra.mxu1 %v2083_v58  ;;  %v2095_v60 = vld [vmem:[#allocation14 + $0x18] sm:$0xff] }
 0x5e4   :  { %1919 = vrot.lane.b32.xlu1 %v1757_v61, %s5134_s24  ;;  %v4498_v62 = vpop.f32.mrf.mxu0  ;;  %4541 = vmatprep.subr.mxu1 %v2082_v59 }
 0x5e5   :  { %v4513_v63 = vpop.f32.mrf.mxu1  ;;  %4542 = vmatpush3.msra.mxu1 %v2082_v59  ;;  %v4210_v62 = vld [vmem:[%s5836_s18] ss:$0 sm:$0xff] }
 0x5e6   :  { %v1684_v2 = vpop.f32.mrf.mxu0  ;;  %4560 = vmatprep.subr.mxu1 %v2095_v60 }
 0x5e7   :  { %1917 = vrot.lane.b32.xlu0 %v1684_v2, %s5134_s24  ;;  %v1903_v3 = vpop.f32.mrf.mxu1 }
 0x5e8   :  { %v4508_v4 = vpop.f32.mrf.mxu0  ;;  %1927 = vrot.lane.b32.xlu1 %v1903_v3, %s5135_s12 }
 0x5e9   :  { %v4523_v5 = vpop.f32.mrf.mxu1 }
 0x5ea   :  { %v1830_v6 = vpop.f32.mrf.mxu0 }
 0x5eb   :  { %1925 = vrot.lane.b32.xlu0 %v1830_v6, %s5135_s12 }
 0x5ec   :  { %v4518_v7 = vpop.f32.mrf.mxu0 }
 0x651   :  { %v1912_v9 = vpop.permute.xlu1 %1911 }
 0x652   :  { %v1932_v16 = vsel %vm642_vm2, %v1465_v52, %v1912_v9 }
 0x655   :  { %v1910_v11 = vpop.permute.xlu0 %1909 }
 0x656   :  { %v1920_v12 = vpop.permute.xlu1 %1919  ;;  %v1931_v14 = vsel %vm642_vm2, %v1392_v50, %v1910_v11 }
 0x657   :  { %v1935_v19 = vsel %vm1933_vm3, %v1932_v16, %v1920_v12 }
 0x659   :  { %v1918_v13 = vpop.permute.xlu0 %1917 }
 0x65a   :  { %v1928_v15 = vpop.permute.xlu1 %1927  ;;  %v1934_v17 = vsel %vm1933_vm3, %v1931_v14, %v1918_v13 }
 0x65b   :  { %v1938_v21 = vsel %vm1936_vm4, %v1935_v19, %v1928_v15  ;;  %v4206_v19 = vld [vmem:[%s5838_s27] ss:$0 sm:$0xff] }
 0x65d   :  { %v1926_v18 = vpop.permute.xlu0 %1925 }
 0x65e   :  { %v1937_v20 = vsel %vm1936_vm4, %v1934_v17, %v1926_v18  ;;  %v4205_v17 = vld [vmem:[%s5837_s22] ss:$0 sm:$0xff] }
 0x65f   :  { %4532 = vmatprep.mubr.msk.f32.mxu0 %vm273_vm0, %v1937_v20 }
 0x660   :  { %4533 = vmatmul.mubr.msk.f32.vlgmr.msra.gmra.mxu0 %vm273_vm0, %v1938_v21 }
 0x661   :  { %4547 = vmatpush3.msra.mxu0 %v2090_v29  ;;  %v2093_v29 = vld [vmem:[#allocation14 + $0x8] sm:$0xff] }
 0x662   :  { %4548 = vmatprep.subr.mxu0 %v2089_v30 }
 0x663   :  { %4549 = vmatpush3.msra.mxu0 %v2089_v30  ;;  %v2092_v30 = vld [vmem:[#allocation14] sm:$0xff] }
 0x720   :  { %v4534_v23 = vpop.f32.mrf.mxu0 }
 0x721   :  { %v2023_v24 = vadd.f32 %v4534_v23, %v4202_v22 }
 0x722   :  { %v2017_v25 = vpop.f32.mrf.mxu0 }
 0x723   :  { %v5512_v26 = vadd.f32 %v2023_v24, %v5339_v1  ;;  %v2018_v10 = vadd.f32 %v4202_v22, %v2017_v25  ;;  %v5522_v1 = vld [vmem:[%s5834_s15] sm:$0xff] }
 0x724   :  { %v2078_v32 = vadd.f32 %v2074_v31, %v5522_v1 }
 0x725   :  { %v5515_v27 = vadd.f32 %v2018_v10, %v5337_v0  ;;  %v2033_v8 = vsel %vm273_vm0, %v5512_v26, 0.0  ;;  %v2088_v0 = vld [vmem:[#allocation13 + $0x8] sm:$0xff] }
 0x726   :  { %2034 = vadd.xlane.f32.xlu1 %v2033_v8  ;;  %4554 = vmatprep.mubr.msk.f32.mxu0 %vm273_vm0, %v2078_v32 }
 0x727   :  { %v2030_v28 = vsel %vm273_vm0, %v5515_v27, 0.0  ;;  %4550 = vmatprep.subr.mxu0 %v2088_v0 }
 0x728   :  { %2031 = vadd.xlane.f32.xlu0 %v2030_v28  ;;  %4551 = vmatpush3.msra.mxu0 %v2088_v0  ;;  %v2094_v28 = vld [vmem:[#allocation14 + $0x10] sm:$0xff] }
 0x729   :  { %4552 = vmatprep.subr.mxu0 %v2087_v38 }
 0x72a   :  { %4553 = vmatpush3.msra.mxu0 %v2087_v38 }
 0x72b   :  { %4555 = vmatmul.mubr.msk.f32.vlgmr.msra.gmra.mxu0 %vm273_vm0, %v2079_v39  ;;  %4574 = vmatprep.subr.mxu0 %v5129_v46 }
 0x72c   :  { %4557 = vmatprep.mubr.msk.f32.mxu0 %vm273_vm0, %v2080_v41 }
 0x72f   :  { %4558 = vmatmul.mubr.msk.f32.gmra.mxu0 %vm273_vm0, %v2081_v44 }
 0x730   :  { %4578 = vmatprep.mubr.msk.f32.mxu0 %vm5130_vm1, %v5129_v46 }
 0x7af   :  { %v2035_v45 = vpop.xlane.xlu1 %2034 }
 0x7b0   :  { %v2037_v47 = vmul.f32 0.03125, %v2035_v45 }
 0x7b1   :  { %v2032_v48 = vpop.xlane.xlu0 %2031 }
 0x7b2   :  { %v2036_v49 = vmul.f32 0.03125, %v2032_v48  ;;  %v2039_v50 = vsub.f32 %v5512_v26, %v2037_v47 }
 0x7b4   :  { %v2038_v51 = vsub.f32 %v5515_v27, %v2036_v49  ;;  %v2041_v54 = vmul.f32 %v2039_v50, %v2039_v50 }
 0x7b6   :  { %v2040_v52 = vmul.f32 %v2038_v51, %v2038_v51  ;;  %v2045_v55 = vsel %vm273_vm0, %v2041_v54, 0.0 }
 0x7b8   :  { %v2042_v53 = vsel %vm273_vm0, %v2040_v52, 0.0 }
 0x7b9   :  { %2043 = vadd.xlane.f32.xlu0 %v2042_v53  ;;  %v4215_v53 = vld [vmem:[%s5840_s23] ss:$0 sm:$0xff] }
 0x7bd   :  { %2046 = vadd.xlane.f32.xlu0 %v2045_v55 }
 0x7eb   :  { %v4556_v61 = vpop.f32.mrf.mxu0 }
 0x7ec   :  { %v2279_v63 = vadd.f32 %v4556_v61, %v4210_v62 }
 0x7ed   :  { %v2273_v2 = vpop.f32.mrf.mxu0 }
 0x7ee   :  { %4575 = vmatpush3.xpose.msk.msra.mxu0 %vm642_vm2, %v2279_v63  ;;  %2415 = vrot.lane.b32.xlu0 %v2279_v63, %s5131_s21  ;;  %v5556_v4 = vadd.f32 %v4210_v62, %v2273_v2 }
 0x7ef   :  { %v4559_v3 = vpop.f32.mrf.mxu0  ;;  %4576 = vmatprep.subr.mxu0 %v5129_v46 }
 0x7f0   :  { %v2289_v5 = vadd.f32 %v4559_v3, %v4210_v62 }
 0x7f1   :  { %v2283_v6 = vpop.f32.mrf.mxu0 }
 0x7f2   :  { %2419 = vrot.lane.b32.xlu1 %v2289_v5, %s5131_s21  ;;  %4577 = vmatpush3.xpose.msk.msra.mxu0 %vm642_vm2, %v5556_v4  ;;  %v2284_v7 = vadd.f32 %v4210_v62, %v2283_v6 }
 0x7f3   :  { %2421 = vrot.lane.b32.xlu0 %v5556_v4, %s5132_s25  ;;  %4588 = vmatprep.subr.mxu0 %v5129_v46 }
 0x7f6   :  { %2413 = vrot.lane.b32.xlu1 %v5556_v4, %s5131_s21 }
 0x7fa   :  { %2417 = vrot.lane.b32.xlu1 %v2284_v7, %s5131_s21 }
 0x7fe   :  { %2423 = vrot.lane.b32.xlu1 %v2279_v63, %s5132_s25 }
 0x802   :  { %2427 = vrot.lane.b32.xlu1 %v2289_v5, %s5132_s25 }
 0x806   :  { %2425 = vrot.lane.b32.xlu1 %v2284_v7, %s5132_s25 }
 0x80a   :  { %2431 = vrot.lane.b32.xlu1 %v2279_v63, %s5133_s29 }
 0x80e   :  { %2435 = vrot.lane.b32.xlu1 %v2289_v5, %s5133_s29 }
 0x812   :  { %2433 = vrot.lane.b32.xlu1 %v2284_v7, %s5133_s29 }
 0x842   :  { %v2044_v9 = vpop.xlane.xlu0 %2043 }
 0x843   :  { %v2048_v11 = vmul.f32 0.03125, %v2044_v9 }
 0x845   :  { %v2050_v12 = vadd.f32 1e-05, %v2048_v11 }
 0x846   :  { %v2047_v13 = vpop.xlane.xlu0 %2046 }
 0x847   :  { %4813 = vrsqrt.f32 %v2050_v12  ;;  %v2049_v14 = vmul.f32 0.03125, %v2047_v13 }
 0x849   :  { %v2051_v15 = vadd.f32 1e-05, %v2049_v14 }
 0x84b   :  { %4815 = vrsqrt.f32 %v2051_v15 }
 0x854   :  { %v4814_v16 = vpop.eup %4813 }
 0x855   :  { %v2054_v18 = vmul.f32 %v4814_v16, %v2038_v51 }
 0x857   :  { %v2062_v20 = vmul.f32 %v4205_v17, %v2054_v18 }
 0x858   :  { %v4816_v21 = vpop.eup %4815 }
 0x859   :  { %v2055_v22 = vmul.f32 %v4816_v21, %v2039_v50  ;;  %v2070_v23 = vadd.f32 %v4206_v19, %v2062_v20 }
 0x85b   :  { %v2063_v24 = vmul.f32 %v4205_v17, %v2055_v22  ;;  %v2072_v25 = vadd.f32 %v2070_v23, %v5355_v35 }
 0x85d   :  { %v2071_v10 = vadd.f32 %v4206_v19, %v2063_v24  ;;  %4543 = vmatprep.mubr.msk.f32.mxu1 %vm273_vm0, %v2072_v25 }
 0x85f   :  { %v2073_v8 = vadd.f32 %v2071_v10, %v5359_v40  ;;  %v4207_v40 = vld [vmem:[%s5839_s17] ss:$0 sm:$0xff] }
 0x860   :  { %v2416_v34 = vpop.permute.xlu0 %2415 }
 0x861   :  { %4544 = vmatmul.mubr.msk.f32.vlgmr.msra.gmra.mxu1 %vm273_vm0, %v2073_v8 }
 0x862   :  { %4561 = vmatpush3.msra.mxu1 %v2095_v60  ;;  %4568 = vmatprep.mubr.msk.f32.mxu1 %vm273_vm0, %v5522_v1 }
 0x863   :  { %4562 = vmatprep.subr.mxu1 %v2094_v28 }
 0x864   :  { %4563 = vmatpush3.msra.mxu1 %v2094_v28  ;;  %v2420_v35 = vpop.permute.xlu1 %2419 }
 0x865   :  { %4564 = vmatprep.subr.mxu1 %v2093_v29  ;;  %v2422_v41 = vpop.permute.xlu0 %2421 }
 0x866   :  { %4565 = vmatpush3.msra.mxu1 %v2093_v29 }
 0x867   :  { %4566 = vmatprep.subr.mxu1 %v2092_v30 }
 0x868   :  { %4567 = vmatpush3.msra.mxu1 %v2092_v30  ;;  %v2414_v32 = vpop.permute.xlu1 %2413 }
 0x869   :  { %4581 = vmatprep.subr.mxu1 %v5129_v46  ;;  %4569 = vmatmul.mubr.msk.f32.vlgmr.msra.gmra.mxu1 %vm273_vm0, %v5527_v33 }
 0x86a   :  { %4582 = vmatpush3.xpose.msk.msra.mxu1 %vm642_vm2, %v2289_v5  ;;  %4571 = vmatprep.mubr.msk.f32.mxu1 %vm273_vm0, %v5531_v36 }
 0x86b   :  { %4583 = vmatprep.subr.mxu1 %v5129_v46 }
 0x86c   :  { %v2418_v36 = vpop.permute.xlu1 %2417 }
 0x86d   :  { %4572 = vmatmul.mubr.msk.f32.gmra.mxu1 %vm273_vm0, %v5538_v42 }
 0x86e   :  { %4584 = vmatpush3.xpose.msk.msra.mxu1 %vm642_vm2, %v2284_v7  ;;  %4585 = vmatprep.mubr.msk.f32.mxu1 %vm5130_vm1, %v5129_v46 }
 0x86f   :  { %4595 = vmatprep.subr.mxu1 %v5129_v46 }
 0x870   :  { %v2424_v37 = vpop.permute.xlu1 %2423 }
 0x874   :  { %v2428_v38 = vpop.permute.xlu1 %2427 }
 0x878   :  { %v2426_v39 = vpop.permute.xlu1 %2425 }
 0x87c   :  { %v2432_v42 = vpop.permute.xlu1 %2431 }
 0x880   :  { %v2436_v47 = vpop.permute.xlu1 %2435 }
 0x884   :  { %v2434_v51 = vpop.permute.xlu1 %2433 }
 0x921   :  { %v4545_v1 = vpop.f32.mrf.mxu1 }
 0x922   :  { %v2186_v31 = vadd.f32 %v4545_v1, %v4207_v40 }
 0x923   :  { %v2180_v0 = vpop.f32.mrf.mxu1 }
 0x924   :  { %v2181_v33 = vadd.f32 %v4207_v40, %v2180_v0  ;;  %2407 = vrot.lane.b32.xlu1 %v2186_v31, %s5133_s29  ;;  %2399 = vrot.lane.b32.xlu0 %v2186_v31, %s5131_s21 }
 0x925   :  { %4586 = vmatmul.mubr.msk.f32.vlgmr.msra.gmra.mxu1 %vm642_vm2, %v2186_v31 }
 0x926   :  { %4579 = vmatmul.mubr.msk.f32.vlgmr.msra.gmra.mxu0 %vm642_vm2, %v2181_v33  ;;  %4596 = vmatpush3.xpose.msk.msra.mxu1 %vm642_vm2, %v2420_v35 }
 0x927   :  { %4589 = vmatpush3.xpose.msk.msra.mxu0 %vm642_vm2, %v2416_v34  ;;  %4597 = vmatprep.subr.mxu1 %v5129_v46 }
 0x928   :  { %2397 = vrot.lane.b32.xlu0 %v2181_v33, %s5131_s21  ;;  %4590 = vmatprep.subr.mxu0 %v5129_v46 }
 0x929   :  { %4599 = vmatprep.mubr.msk.f32.mxu1 %vm5130_vm1, %v5129_v46  ;;  %4592 = vmatprep.mubr.msk.f32.mxu0 %vm5130_vm1, %v5129_v46  ;;  %v4570_v44 = vpop.f32.mrf.mxu1 }
 0x92a   :  { %4598 = vmatpush3.xpose.msk.msra.mxu1 %vm642_vm2, %v2418_v36  ;;  %v2382_v59 = vadd.f32 %v4570_v44, %v4215_v53 }
 0x92b   :  { %4591 = vmatpush3.xpose.msk.msra.mxu0 %vm642_vm2, %v2414_v32  ;;  %4609 = vmatprep.subr.mxu1 %v5129_v46  ;;  %v2376_v48 = vpop.f32.mrf.mxu1 }
 0x92c   :  { %2403 = vrot.lane.b32.xlu0 %v2186_v31, %s5132_s25  ;;  %4602 = vmatprep.subr.mxu0 %v5129_v46  ;;  %v5653_v61 = vadd.f32 %v4215_v53, %v2376_v48 }
 0x92d   :  { %v4573_v50 = vpop.f32.mrf.mxu1 }
 0x92e   :  { %v5640_v54 = vadd.f32 %v4573_v50, %v4215_v53 }
 0x92f   :  { %v2386_v55 = vpop.f32.mrf.mxu1 }
 0x930   :  { %2401 = vrot.lane.b32.xlu0 %v2181_v33, %s5132_s25  ;;  %v5645_v58 = vadd.f32 %v4215_v53, %v2386_v55 }
 0x934   :  { %2429 = vrot.lane.b32.xlu0 %v5556_v4, %s5133_s29 }
 0x938   :  { %2405 = vrot.lane.b32.xlu0 %v2181_v33, %s5133_s29 }
 0x996   :  { %v2400_v43 = vpop.permute.xlu0 %2399  ;;  %v2408_v56 = vpop.permute.xlu1 %2407 }
 0x997   :  { %4600 = vmatmul.mubr.msk.f32.vlgmr.msra.gmra.mxu1 %vm642_vm2, %v2400_v43 }
 0x998   :  { %4610 = vmatpush3.xpose.msk.msra.mxu1 %vm642_vm2, %v2428_v38  ;;  %4613 = vmatprep.mubr.msk.f32.mxu1 %vm5130_vm1, %v5129_v46 }
 0x999   :  { %4611 = vmatprep.subr.mxu1 %v5129_v46 }
 0x99a   :  { %v2398_v45 = vpop.permute.xlu0 %2397 }
 0x99b   :  { %4593 = vmatmul.mubr.msk.f32.vlgmr.msra.gmra.mxu0 %vm642_vm2, %v2398_v45 }
 0x99c   :  { %4603 = vmatpush3.xpose.msk.msra.mxu0 %vm642_vm2, %v2424_v37  ;;  %4612 = vmatpush3.xpose.msk.msra.mxu1 %vm642_vm2, %v2426_v39 }
 0x99d   :  { %4623 = vmatprep.subr.mxu1 %v5129_v46  ;;  %4604 = vmatprep.subr.mxu0 %v5129_v46 }
 0x99e   :  { %v2404_v49 = vpop.permute.xlu0 %2403  ;;  %4606 = vmatprep.mubr.msk.f32.mxu0 %vm5130_vm1, %v5129_v46 }
 0x99f   :  { %4614 = vmatmul.mubr.msk.f32.vlgmr.msra.gmra.mxu1 %vm642_vm2, %v2404_v49 }
 0x9a0   :  { %4605 = vmatpush3.xpose.msk.msra.mxu0 %vm642_vm2, %v2422_v41  ;;  %4624 = vmatpush3.xpose.msk.msra.mxu1 %vm642_vm2, %v2436_v47 }
 0x9a1   :  { %4625 = vmatprep.subr.mxu1 %v5129_v46  ;;  %4616 = vmatprep.subr.mxu0 %v5129_v46 }
 0x9a2   :  { %v2402_v52 = vpop.permute.xlu0 %2401  ;;  %4627 = vmatprep.mubr.msk.f32.mxu1 %vm5130_vm1, %v5129_v46 }
 0x9a3   :  { %4607 = vmatmul.mubr.msk.f32.vlgmr.msra.gmra.mxu0 %vm642_vm2, %v2402_v52 }
 0x9a4   :  { %4617 = vmatpush3.xpose.msk.msra.mxu0 %vm642_vm2, %v2432_v42  ;;  %4626 = vmatpush3.xpose.msk.msra.mxu1 %vm642_vm2, %v2434_v51 }
 0x9a5   :  { %4618 = vmatprep.subr.mxu0 %v5129_v46  ;;  %4620 = vmatprep.mubr.msk.f32.mxu0 %vm5130_vm1, %v5129_v46 }
 0x9a6   :  { %v2430_v57 = vpop.permute.xlu0 %2429  ;;  %4637 = vmatprep.subr.mxu1 %v5129_v46 }
 0x9a7   :  { %4628 = vmatmul.mubr.msk.f32.vlgmr.msra.gmra.mxu1 %vm642_vm2, %v2408_v56 }
 0x9a8   :  { %4619 = vmatpush3.xpose.msk.msra.mxu0 %vm642_vm2, %v2430_v57  ;;  %4638 = vmatpush3.msra.mxu1 %v5640_v54 }
 0x9a9   :  { %4630 = vmatprep.subr.mxu0 %v5129_v46  ;;  %4639 = vmatprep.subr.mxu1 %v5129_v46 }
 0x9aa   :  { %v2406_v60 = vpop.permute.xlu0 %2405  ;;  %4640 = vmatpush3.msra.mxu1 %v5645_v58  ;;  %4641 = vmatprep.mubr.msk.f32.mxu1 %vm5130_vm1, %v5129_v46 }
 0x9ab   :  { %4621 = vmatmul.mubr.msk.f32.vlgmr.msra.gmra.mxu0 %vm642_vm2, %v2406_v60  ;;  %4651 = vmatprep.subr.mxu1 %v5129_v46 }
 0x9ac   :  { %4631 = vmatpush3.msra.mxu0 %v2382_v59  ;;  %4634 = vmatprep.mubr.msk.f32.mxu0 %vm5130_vm1, %v5129_v46 }
 0x9ad   :  { %4632 = vmatprep.subr.mxu0 %v5129_v46 }
 0x9ae   :  { %4633 = vmatpush3.msra.mxu0 %v5653_v61 }
 0x9af   :  { %4644 = vmatprep.subr.mxu0 %v5129_v46 }
 0x9e5   :  { %v2625_v62 = vpop.f32.mrf.mxu1 }
 0x9e6   :  { %v3088_v63 = vsel %vm1933_vm3, %v2625_v62, -inf  ;;  %v2549_v2 = vpop.f32.mrf.mxu0 }
 0x9e7   :  { %3089 = vmax.xlane.f32.xlu1 %v3088_v63  ;;  %v4587_v3 = vpop.f32.mrf.mxu1  ;;  %v3085_v4 = vsel %vm1933_vm3, %v2549_v2, -inf }
 0x9e8   :  { %3086 = vmax.xlane.f32.xlu0 %v3085_v4  ;;  %v4580_v5 = vpop.f32.mrf.mxu0 }
 0xa57   :  { %v2777_v6 = vpop.f32.mrf.mxu1 }
 0xa58   :  { %v3094_v7 = vsel %vm1933_vm3, %v2777_v6, -inf }
 0xa59   :  { %v4601_v9 = vpop.f32.mrf.mxu1  ;;  %3095 = vmax.xlane.f32.xlu0 %v3094_v7 }
 0xa5b   :  { %v2701_v11 = vpop.f32.mrf.mxu0 }
 0xa5c   :  { %v3091_v12 = vsel %vm1933_vm3, %v2701_v11, -inf }
 0xa5d   :  { %3092 = vmax.xlane.f32.xlu0 %v3091_v12  ;;  %v4594_v13 = vpop.f32.mrf.mxu0 }
 0xa5f   :  { %v2929_v14 = vpop.f32.mrf.mxu1 }
 0xa60   :  { %v3100_v15 = vsel %vm1933_vm3, %v2929_v14, -inf }
 0xa61   :  { %3101 = vmax.xlane.f32.xlu1 %v3100_v15  ;;  %v4615_v16 = vpop.f32.mrf.mxu1 }
 0xa63   :  { %v2853_v17 = vpop.f32.mrf.mxu0 }
 0xa64   :  { %v3097_v18 = vsel %vm1933_vm3, %v2853_v17, -inf }
 0xa65   :  { %3098 = vmax.xlane.f32.xlu0 %v3097_v18  ;;  %v4608_v19 = vpop.f32.mrf.mxu0 }
 0xa67   :  { %v3081_v20 = vpop.f32.mrf.mxu1 }
 0xa68   :  { %v3106_v21 = vsel %vm1933_vm3, %v3081_v20, -inf }
 0xa69   :  { %3107 = vmax.xlane.f32.xlu1 %v3106_v21  ;;  %v4629_v22 = vpop.f32.mrf.mxu1 }
 0xa6b   :  { %v3005_v23 = vpop.f32.mrf.mxu0 }
 0xa6c   :  { %v3103_v24 = vsel %vm1933_vm3, %v3005_v23, -inf }
 0xa6d   :  { %3104 = vmax.xlane.f32.xlu0 %v3103_v24  ;;  %v4622_v25 = vpop.f32.mrf.mxu0 }
 0xa70   :  { %v3090_v28 = vpop.xlane.xlu1 %3089 }
 0xa71   :  { %v3087_v10 = vpop.xlane.xlu0 %3086  ;;  %v3110_v29 = vsub.f32 %v2625_v62, %v3090_v28 }
 0xa72   :  { %v3109_v8 = vsub.f32 %v2549_v2, %v3087_v10 }
 0xa73   :  { %v3119_v35 = vmul.f32 1.442695, %v3110_v29 }
 0xa74   :  { %v3117_v30 = vmul.f32 1.442695, %v3109_v8 }
 0xa76   :  { %4817 = vpow2.f32 %v3117_v30 }
 0xa77   :  { %4819 = vpow2.f32 %v3119_v35 }
 0xa7a   :  { %2447 = vrot.lane.b32.xlu1 %v5640_v54, %s5131_s21 }
 0xa7e   :  { %2441 = vrot.lane.b32.xlu1 %v5653_v61, %s5131_s21 }
 0xa82   :  { %2445 = vrot.lane.b32.xlu1 %v5645_v58, %s5131_s21 }
 0xa83   :  { %2443 = vrot.lane.b32.xlu0 %v2382_v59, %s5131_s21  ;;  %v5690_v40 = vpop.eup %4817 }
 0xa84   :  { %v3133_v1 = vsel %vm1933_vm3, %v5690_v40, 0.0  ;;  %v5694_v31 = vpop.eup %4819 }
 0xa85   :  { %v3136_v0 = vsel %vm1933_vm3, %v5694_v31, 0.0 }
 0xa86   :  { %2459 = vrot.lane.b32.xlu1 %v5640_v54, %s5132_s25 }
 0xa87   :  { %2455 = vrot.lane.b32.xlu0 %v2382_v59, %s5132_s25 }
 0xa8a   :  { %2457 = vrot.lane.b32.xlu1 %v5645_v58, %s5132_s25 }
 0xa8b   :  { %2453 = vrot.lane.b32.xlu0 %v5653_v61, %s5132_s25 }
 0xa8e   :  { %2471 = vrot.lane.b32.xlu1 %v5640_v54, %s5133_s29 }
 0xa8f   :  { %2467 = vrot.lane.b32.xlu0 %v2382_v59, %s5133_s29 }
 0xaae   :  { %3134 = vadd.xlane.f32.xlu0 %v3133_v1 }
 0xab2   :  { %3137 = vadd.xlane.f32.xlu1 %v3136_v0 }
 0xae2   :  { %v3096_v32 = vpop.xlane.xlu0 %3095 }
 0xae3   :  { %v3112_v33 = vsub.f32 %v2777_v6, %v3096_v32 }
 0xae5   :  { %v3123_v34 = vmul.f32 1.442695, %v3112_v33 }
 0xae6   :  { %v3093_v36 = vpop.xlane.xlu0 %3092 }
 0xae7   :  { %4821 = vpow2.f32 %v3123_v34  ;;  %v3111_v37 = vsub.f32 %v2701_v11, %v3093_v36 }
 0xae9   :  { %v3121_v38 = vmul.f32 1.442695, %v3111_v37 }
 0xaea   :  { %v3102_v39 = vpop.xlane.xlu1 %3101 }
 0xaeb   :  { %4823 = vpow2.f32 %v3121_v38  ;;  %v3114_v41 = vsub.f32 %v2929_v14, %v3102_v39 }
 0xaed   :  { %v3127_v42 = vmul.f32 1.442695, %v3114_v41 }
 0xaee   :  { %v3099_v43 = vpop.xlane.xlu0 %3098 }
 0xaef   :  { %4825 = vpow2.f32 %v3127_v42  ;;  %v3113_v44 = vsub.f32 %v2853_v17, %v3099_v43 }
 0xaf1   :  { %v3125_v45 = vmul.f32 1.442695, %v3113_v44 }
 0xaf2   :  { %v3108_v47 = vpop.xlane.xlu1 %3107 }
 0xaf3   :  { %4827 = vpow2.f32 %v3125_v45  ;;  %v3116_v48 = vsub.f32 %v3081_v20, %v3108_v47  ;;  %v2100_v45 = vld [vmem:[#allocation16 + $0x18] sm:$0xff]  ;;  %v2099_v47 = vld [vmem:[#allocation16 + $0x10] sm:$0xff] }
 0xaf4   :  { %v5698_v49 = vpop.eup %4821 }
 0xaf5   :  { %v3131_v50 = vmul.f32 1.442695, %v3116_v48  ;;  %v3142_v51 = vsel %vm1933_vm3, %v5698_v49, 0.0  ;;  %v2098_v48 = vld [vmem:[#allocation16 + $0x8] sm:$0xff] }
 0xaf6   :  { %3143 = vadd.xlane.f32.xlu1 %v3142_v51  ;;  %v3105_v52 = vpop.xlane.xlu0 %3104  ;;  %v2448_v5 = vpop.permute.xlu1 %2447  ;;  %v2097_v51 = vld [vmem:[#allocation16] sm:$0xff] }
 0xaf7   :  { %4829 = vpow2.f32 %v3131_v50  ;;  %v3115_v53 = vsub.f32 %v3005_v23, %v3105_v52 }
 0xaf8   :  { %v5702_v54 = vpop.eup %4823 }
 0xaf9   :  { %v3129_v55 = vmul.f32 1.442695, %v3115_v53  ;;  %v3139_v56 = vsel %vm1933_vm3, %v5702_v54, 0.0 }
 0xafa   :  { %3140 = vadd.xlane.f32.xlu0 %v3139_v56  ;;  %v2442_v6 = vpop.permute.xlu1 %2441  ;;  %v2444_v7 = vpop.permute.xlu0 %2443 }
 0xafb   :  { %4831 = vpow2.f32 %v3129_v55 }
 0xafc   :  { %v5706_v57 = vpop.eup %4825 }
 0xafd   :  { %v3148_v59 = vsel %vm1933_vm3, %v5706_v57, 0.0 }
 0xafe   :  { %3149 = vadd.xlane.f32.xlu1 %v3148_v59  ;;  %v2446_v9 = vpop.permute.xlu1 %2445  ;;  %v2456_v11 = vpop.permute.xlu0 %2455 }
 0xb00   :  { %v5710_v60 = vpop.eup %4827 }
 0xb01   :  { %v3145_v62 = vsel %vm1933_vm3, %v5710_v60, 0.0 }
 0xb02   :  { %3146 = vadd.xlane.f32.xlu0 %v3145_v62  ;;  %v2460_v12 = vpop.permute.xlu1 %2459  ;;  %v2454_v13 = vpop.permute.xlu0 %2453 }
 0xb04   :  { %v5714_v63 = vpop.eup %4829 }
 0xb05   :  { %v3154_v2 = vsel %vm1933_vm3, %v5714_v63, 0.0 }
 0xb06   :  { %3155 = vadd.xlane.f32.xlu1 %v3154_v2  ;;  %v2458_v14 = vpop.permute.xlu1 %2457  ;;  %v2468_v15 = vpop.permute.xlu0 %2467 }
 0xb08   :  { %v5718_v3 = vpop.eup %4831 }
 0xb09   :  { %v3151_v4 = vsel %vm1933_vm3, %v5718_v3, 0.0 }
 0xb0a   :  { %3152 = vadd.xlane.f32.xlu0 %v3151_v4  ;;  %v2472_v16 = vpop.permute.xlu1 %2471 }
 0xb17   :  { %2469 = vrot.lane.b32.xlu1 %v5645_v58, %s5133_s29 }
 0xb20   :  { %2465 = vrot.lane.b32.xlu0 %v5653_v61, %s5133_s29 }
 0xb37   :  { %v3135_v17 = vpop.xlane.xlu0 %3134 }
 0xb38   :  { %4833 = vrcp.f32 %v3135_v17 }
 0xb3b   :  { %v3138_v18 = vpop.xlane.xlu1 %3137 }
 0xb3c   :  { %4835 = vrcp.f32 %v3138_v18 }
 0xb45   :  { %v4834_v19 = vpop.eup %4833 }
 0xb46   :  { %v3165_v58 = vmul.f32 %v4834_v19, %v5690_v40 }
 0xb48   :  { %4635 = vmatmul.mubr.msk.f32.vlgmr.msra.gmra.mxu0 %vm1933_vm3, %v3165_v58 }
 0xb49   :  { %v4836_v20 = vpop.eup %4835  ;;  %4645 = vmatpush3.msra.mxu0 %v2444_v7  ;;  %4648 = vmatprep.mubr.msk.f32.mxu0 %vm5130_vm1, %v5129_v46 }
 0xb4a   :  { %4646 = vmatprep.subr.mxu0 %v5129_v46  ;;  %v3166_v61 = vmul.f32 %v4836_v20, %v5694_v31 }
 0xb4b   :  { %4647 = vmatpush3.msra.mxu0 %v2442_v6 }
 0xb4c   :  { %4642 = vmatmul.mubr.msk.f32.vlgmr.msra.gmra.mxu1 %vm1933_vm3, %v3166_v61  ;;  %4658 = vmatprep.subr.mxu0 %v5129_v46 }
 0xb4d   :  { %4652 = vmatpush3.msra.mxu1 %v2448_v5  ;;  %4655 = vmatprep.mubr.msk.f32.mxu1 %vm5130_vm1, %v5129_v46 }
 0xb4e   :  { %4653 = vmatprep.subr.mxu1 %v5129_v46 }
 0xb4f   :  { %4654 = vmatpush3.msra.mxu1 %v2446_v9 }
 0xb50   :  { %4665 = vmatprep.subr.mxu1 %v5129_v46 }
 0xb7f   :  { %v3144_v21 = vpop.xlane.xlu1 %3143 }
 0xb80   :  { %4837 = vrcp.f32 %v3144_v21 }
 0xb83   :  { %v3141_v22 = vpop.xlane.xlu0 %3140 }
 0xb84   :  { %4839 = vrcp.f32 %v3141_v22 }
 0xb87   :  { %v3150_v23 = vpop.xlane.xlu1 %3149 }
 0xb88   :  { %4841 = vrcp.f32 %v3150_v23 }
 0xb8b   :  { %v3147_v24 = vpop.xlane.xlu0 %3146 }
 0xb8c   :  { %4843 = vrcp.f32 %v3147_v24 }
 0xb8d   :  { %v4838_v25 = vpop.eup %4837 }
 0xb8e   :  { %v3168_v10 = vmul.f32 %v4838_v25, %v5698_v49 }
 0xb8f   :  { %v3156_v8 = vpop.xlane.xlu1 %3155 }
 0xb90   :  { %4845 = vrcp.f32 %v3156_v8  ;;  %4656 = vmatmul.mubr.msk.f32.vlgmr.msra.gmra.mxu1 %vm1933_vm3, %v3168_v10 }
 0xb91   :  { %v4840_v28 = vpop.eup %4839  ;;  %4666 = vmatpush3.msra.mxu1 %v2460_v12  ;;  %4669 = vmatprep.mubr.msk.f32.mxu1 %vm5130_vm1, %v5129_v46 }
 0xb92   :  { %4667 = vmatprep.subr.mxu1 %v5129_v46  ;;  %v3167_v29 = vmul.f32 %v4840_v28, %v5702_v54  ;;  %v3923_v28 = vld [vmem:[#allocation17 + $0x18] sm:$0xff] }
 0xb93   :  { %4668 = vmatpush3.msra.mxu1 %v2458_v14  ;;  %v3153_v30 = vpop.xlane.xlu0 %3152  ;;  %v2470_v31 = vpop.permute.xlu1 %2469 }
 0xb94   :  { %4847 = vrcp.f32 %v3153_v30  ;;  %4649 = vmatmul.mubr.msk.f32.vlgmr.msra.gmra.mxu0 %vm1933_vm3, %v3167_v29  ;;  %4679 = vmatprep.subr.mxu1 %v5129_v46  ;;  %v3922_v29 = vld [vmem:[#allocation17 + $0x10] sm:$0xff]  ;;  %v3921_v30 = vld [vmem:[#allocation17 + $0x8] sm:$0xff] }
 0xb95   :  { %v4842_v35 = vpop.eup %4841  ;;  %4659 = vmatpush3.msra.mxu0 %v2456_v11  ;;  %4662 = vmatprep.mubr.msk.f32.mxu0 %vm5130_vm1, %v5129_v46 }
 0xb96   :  { %4660 = vmatprep.subr.mxu0 %v5129_v46  ;;  %v3170_v40 = vmul.f32 %v4842_v35, %v5706_v57  ;;  %v3920_v35 = vld [vmem:[#allocation17] sm:$0xff] }
 0xb97   :  { %4661 = vmatpush3.msra.mxu0 %v2454_v13  ;;  %v2466_v33 = vpop.permute.xlu0 %2465  ;;  %v4252_v13 = vld [vmem:[%s5841_s28] ss:$0 sm:$0xff] }
 0xb98   :  { %4670 = vmatmul.mubr.msk.f32.vlgmr.msra.gmra.mxu1 %vm1933_vm3, %v3170_v40  ;;  %4672 = vmatprep.subr.mxu0 %v5129_v46  ;;  %v4021_v40 = vld [vmem:[%s5285_s6 + $0x38] sm:$0xff] }
 0xb99   :  { %v4844_v1 = vpop.eup %4843  ;;  %4680 = vmatpush3.msra.mxu1 %v2472_v16  ;;  %4683 = vmatprep.mubr.msk.f32.mxu1 %vm5130_vm1, %v5129_v46 }
 0xb9a   :  { %4681 = vmatprep.subr.mxu1 %v5129_v46  ;;  %v3169_v0 = vmul.f32 %v4844_v1, %v5710_v60  ;;  %v4020_v1 = vld [vmem:[%s5285_s6 + $0x30] sm:$0xff] }
 0xb9b   :  { %4682 = vmatpush3.msra.mxu1 %v2470_v31  ;;  %v4019_v31 = vld [vmem:[%s5285_s6 + $0x28] sm:$0xff] }
 0xb9c   :  { %4663 = vmatmul.mubr.msk.f32.vlgmr.msra.gmra.mxu0 %vm1933_vm3, %v3169_v0  ;;  %4697 = vmatprep.subr.mxu1 %v3923_v28  ;;  %v4018_v0 = vld [vmem:[%s5285_s6 + $0x20] sm:$0xff] }
 0xb9d   :  { %v4846_v32 = vpop.eup %4845  ;;  %4673 = vmatpush3.msra.mxu0 %v2468_v15  ;;  %4676 = vmatprep.mubr.msk.f32.mxu0 %vm5130_vm1, %v5129_v46 }
 0xb9e   :  { %4674 = vmatprep.subr.mxu0 %v5129_v46  ;;  %v3172_v34 = vmul.f32 %v4846_v32, %v5714_v63 }
 0xb9f   :  { %4675 = vmatpush3.msra.mxu0 %v2466_v33 }
 0xba0   :  { %4684 = vmatmul.mubr.msk.f32.vlgmr.msra.gmra.mxu1 %vm1933_vm3, %v3172_v34  ;;  %4686 = vmatprep.subr.mxu0 %v2100_v45 }
 0xba1   :  { %v4848_v36 = vpop.eup %4847  ;;  %4698 = vmatpush3.msra.mxu1 %v3923_v28 }
 0xba2   :  { %v3171_v37 = vmul.f32 %v4848_v36, %v5718_v3  ;;  %4699 = vmatprep.subr.mxu1 %v3922_v29 }
 0xba3   :  { %4700 = vmatpush3.msra.mxu1 %v3922_v29 }
 0xba4   :  { %4677 = vmatmul.mubr.msk.f32.vlgmr.msra.gmra.mxu0 %vm1933_vm3, %v3171_v37  ;;  %4701 = vmatprep.subr.mxu1 %v3921_v30 }
 0xba5   :  { %4687 = vmatpush3.msra.mxu0 %v2100_v45  ;;  %4702 = vmatpush3.msra.mxu1 %v3921_v30 }
 0xba6   :  { %4688 = vmatprep.subr.mxu0 %v2099_v47  ;;  %4703 = vmatprep.subr.mxu1 %v3920_v35 }
 0xba7   :  { %4689 = vmatpush3.msra.mxu0 %v2099_v47  ;;  %4704 = vmatpush3.msra.mxu1 %v3920_v35 }
 0xba8   :  { %4690 = vmatprep.subr.mxu0 %v2098_v48 }
 0xba9   :  { %4691 = vmatpush3.msra.mxu0 %v2098_v48 }
 0xbaa   :  { %4692 = vmatprep.subr.mxu0 %v2097_v51 }
 0xbab   :  { %4693 = vmatpush3.msra.mxu0 %v2097_v51  ;;  %v4016_v51 = vld [vmem:[%s5285_s6 + $0x10] sm:$0xff] }
 0xbac   :  { %4708 = vmatprep.subr.mxu0 %v4021_v40 }
 0xc08   :  { %v3242_v38 = vpop.f32.mrf.mxu0 }
 0xc0a   :  { %v4636_v39 = vpop.f32.mrf.mxu0 }
 0xc0c   :  { %v3315_v41 = vpop.f32.mrf.mxu1 }
 0xc0e   :  { %v4643_v42 = vpop.f32.mrf.mxu1 }
 0xc50   :  { %v3461_v43 = vpop.f32.mrf.mxu1 }
 0xc51   :  { %3761 = vrot.lane.b32.xlu1 %v3461_v43, %s5120_s26  ;;  %v4256_v43 = vld [vmem:[%s5843_s2] ss:$0 sm:$0xff] }
 0xc52   :  { %v4657_v44 = vpop.f32.mrf.mxu1 }
 0xc54   :  { %v3388_v46 = vpop.f32.mrf.mxu0 }
 0xc55   :  { %3759 = vrot.lane.b32.xlu0 %v3388_v46, %s5120_s26 }
 0xc56   :  { %v4650_v49 = vpop.f32.mrf.mxu0 }
 0xc58   :  { %v3607_v50 = vpop.f32.mrf.mxu1 }
 0xc59   :  { %3769 = vrot.lane.b32.xlu1 %v3607_v50, %s5134_s24  ;;  %v4017_v50 = vld [vmem:[%s5285_s6 + $0x18] sm:$0xff] }
 0xc5a   :  { %v4671_v52 = vpop.f32.mrf.mxu1 }
 0xc5b   :  { %v4015_v52 = vld [vmem:[%s5285_s6 + $0x8] sm:$0xff] }
 0xc5c   :  { %v3534_v53 = vpop.f32.mrf.mxu0 }
 0xc5d   :  { %3767 = vrot.lane.b32.xlu0 %v3534_v53, %s5134_s24  ;;  %v4014_v53 = vld [vmem:[%s5285_s6] sm:$0xff]  ;;  %s4120_s6 = sshll.u32 %s5136_s5, 4  ;;  %s4121_s6 = int_to_ptr.vmem [resolvable:$true] %s4120_s6 }
 0xc5e   :  { %v4664_v54 = vpop.f32.mrf.mxu0  ;;  %p5058_p9 = scmp.lt.s32.totalorder %s4121_s6, %s4121_s6 }
 0xc5f   :  { %v4257_v54 = vld [vmem:[%s5280_s20] ss:$0 sm:$0xff]  ;;  %s5053_s20 = scalar_lea.vmem %s4121_s6, 256 }
 0xc60   :  { %v3753_v55 = vpop.f32.mrf.mxu1  ;;  %p5054_p8 = scmp.ne.s32.totalorder %s4121_s6, %s5053_s20  ;;  %p5059_p10 = scmp.lt.s32.totalorder %s5053_s20, %s5053_s20 }
 0xc61   :  { %3777 = vrot.lane.b32.xlu1 %v3753_v55, %s5135_s12 }
 0xc62   :  { %v4685_v56 = vpop.f32.mrf.mxu1  ;;  %p5060_p11 = por %p5059_p10, %p5058_p9 }
 0xc64   :  { %v3680_v57 = vpop.f32.mrf.mxu0  ;;  %p5061_p12 = pnand %p5060_p11, %p5054_p8 }
 0xc65   :  { %3775 = vrot.lane.b32.xlu0 %v3680_v57, %s5135_s12 }
 0xc66   :  { %v4678_v59 = vpop.f32.mrf.mxu0 }
 0xcc3   :  { %v3762_v60 = vpop.permute.xlu1 %3761 }
 0xcc4   :  { %v3782_v5 = vsel %vm642_vm2, %v3315_v41, %v3762_v60  ;;  %v4255_v41 = vld [vmem:[%s5842_s1] ss:$0 sm:$0xff] }
 0xcc7   :  { %v3760_v62 = vpop.permute.xlu0 %3759 }
 0xcc8   :  { %v3781_v3 = vsel %vm642_vm2, %v3242_v38, %v3760_v62 }
 0xccb   :  { %v3770_v63 = vpop.permute.xlu1 %3769 }
 0xccc   :  { %v3784_v9 = vsel %vm1933_vm3, %v3782_v5, %v3770_v63  ;;  %v4260_v63 = vld [vmem:[%s5290_s4] ss:$0 sm:$0xff] }
 0xccf   :  { %v3768_v2 = vpop.permute.xlu0 %3767 }
 0xcd0   :  { %v3783_v6 = vsel %vm1933_vm3, %v3781_v3, %v3768_v2 }
 0xcd3   :  { %v3778_v4 = vpop.permute.xlu1 %3777 }
 0xcd4   :  { %v3786_v12 = vsel %vm1936_vm4, %v3784_v9, %v3778_v4 }
 0xcd7   :  { %v3776_v7 = vpop.permute.xlu0 %3775 }
 0xcd8   :  { %v3785_v11 = vsel %vm1936_vm4, %v3783_v6, %v3776_v7 }
 0xcd9   :  { %4694 = vmatprep.mubr.msk.f32.mxu0 %vm273_vm0, %v3785_v11 }
 0xcda   :  { %4695 = vmatmul.mubr.msk.f32.vlgmr.msra.gmra.mxu0 %vm273_vm0, %v3786_v12 }
 0xcdb   :  { %4709 = vmatpush3.msra.mxu0 %v4021_v40 }
 0xcdc   :  { %4710 = vmatprep.subr.mxu0 %v4020_v1 }
 0xcdd   :  { %4711 = vmatpush3.msra.mxu0 %v4020_v1 }
 0xcde   :  { %4712 = vmatprep.subr.mxu0 %v4019_v31 }
 0xcdf   :  { %4713 = vmatpush3.msra.mxu0 %v4019_v31 }
 0xce0   :  { %4714 = vmatprep.subr.mxu0 %v4018_v0 }
 0xce1   :  { %4715 = vmatpush3.msra.mxu0 %v4018_v0 }
 0xce2   :  { %4716 = vmatprep.subr.mxu0 %v4017_v50 }
 0xce3   :  { %4717 = vmatpush3.msra.mxu0 %v4017_v50 }
 0xce4   :  { %4718 = vmatprep.subr.mxu0 %v4016_v51 }
 0xce5   :  { %4719 = vmatpush3.msra.mxu0 %v4016_v51 }
 0xce6   :  { %4720 = vmatprep.subr.mxu0 %v4015_v52 }
 0xce7   :  { %4721 = vmatpush3.msra.mxu0 %v4015_v52 }
 0xce8   :  { %4722 = vmatprep.subr.mxu0 %v4014_v53 }
 0xce9   :  { %4723 = vmatpush3.msra.mxu0 %v4014_v53 }
 0xd9a   :  { %v4696_v14 = vpop.f32.mrf.mxu0 }
 0xd9b   :  { %v3871_v15 = vadd.f32 %v4696_v14, %v4252_v13 }
 0xd9c   :  { %v3865_v16 = vpop.f32.mrf.mxu0 }
 0xd9d   :  { %v5780_v17 = vadd.f32 %v3871_v15, %v5512_v26  ;;  %v3866_v18 = vadd.f32 %v4252_v13, %v3865_v16 }
 0xd9f   :  { %v5783_v19 = vadd.f32 %v3866_v18, %v5515_v27  ;;  %v3881_v58 = vsel %vm273_vm0, %v5780_v17, 0.0 }
 0xda0   :  { %3882 = vadd.xlane.f32.xlu1 %v3881_v58 }
 0xda1   :  { %v3878_v20 = vsel %vm273_vm0, %v5783_v19, 0.0 }
 0xda2   :  { %3879 = vadd.xlane.f32.xlu0 %v3878_v20 }
 0xe29   :  { %v3883_v61 = vpop.xlane.xlu1 %3882 }
 0xe2a   :  { %v3885_v21 = vmul.f32 0.03125, %v3883_v61 }
 0xe2b   :  { %v3880_v22 = vpop.xlane.xlu0 %3879 }
 0xe2c   :  { %v3884_v23 = vmul.f32 0.03125, %v3880_v22  ;;  %v3887_v24 = vsub.f32 %v5780_v17, %v3885_v21 }
 0xe2e   :  { %v3886_v26 = vsub.f32 %v5783_v19, %v3884_v23  ;;  %v3889_v10 = vmul.f32 %v3887_v24, %v3887_v24 }
 0xe30   :  { %v3888_v25 = vmul.f32 %v3886_v26, %v3886_v26  ;;  %v3893_v8 = vsel %vm273_vm0, %v3889_v10, 0.0 }
 0xe32   :  { %v3890_v27 = vsel %vm273_vm0, %v3888_v25, 0.0 }
 0xe33   :  { %3891 = vadd.xlane.f32.xlu0 %v3890_v27 }
 0xe37   :  { %3894 = vadd.xlane.f32.xlu0 %v3893_v8 }
 0xebc   :  { %v3892_v32 = vpop.xlane.xlu0 %3891 }
 0xebd   :  { %v3896_v33 = vmul.f32 0.03125, %v3892_v32 }
 0xebf   :  { %v3898_v34 = vadd.f32 1e-06, %v3896_v33 }
 0xec0   :  { %v3895_v36 = vpop.xlane.xlu0 %3894 }
 0xec1   :  { %4849 = vrsqrt.f32 %v3898_v34  ;;  %v3897_v37 = vmul.f32 0.03125, %v3895_v36 }
 0xec3   :  { %v3899_v38 = vadd.f32 1e-06, %v3897_v37 }
 0xec5   :  { %4851 = vrsqrt.f32 %v3899_v38 }
 0xece   :  { %v4850_v39 = vpop.eup %4849 }
 0xecf   :  { %v3902_v42 = vmul.f32 %v4850_v39, %v3886_v26 }
 0xed1   :  { %v3910_v44 = vmul.f32 %v4255_v41, %v3902_v42 }
 0xed2   :  { %v4852_v45 = vpop.eup %4851 }
 0xed3   :  { %v3903_v46 = vmul.f32 %v4852_v45, %v3887_v24  ;;  %v3918_v47 = vadd.f32 %v4256_v43, %v3910_v44 }
 0xed5   :  { %v3911_v48 = vmul.f32 %v4255_v41, %v3903_v46  ;;  %4705 = vmatprep.mubr.msk.f32.mxu1 %vm273_vm0, %v3918_v47 }
 0xed7   :  { %v3919_v49 = vadd.f32 %v4256_v43, %v3911_v48 }
 0xed9   :  { %4706 = vmatmul.mubr.msk.f32.vlgmr.msra.gmra.mxu1 %vm273_vm0, %v3919_v49 }
 0xf99   :  { %v4707_v55 = vpop.f32.mrf.mxu1 }
 0xf9a   :  { %v4009_v56 = vadd.f32 %v4707_v55, %v4257_v54 }
 0xf9b   :  { %v4003_v57 = vpop.f32.mrf.mxu1 }
 0xf9c   :  { %v4004_v59 = vadd.f32 %v4257_v54, %v4003_v57  ;;  %v4013_v62 = vmax.f32 %v4009_v56, 0.0 }
 0xf9e   :  { %v4012_v60 = vmax.f32 %v4004_v59, 0.0 }
 0xfa0   :  { %4724 = vmatprep.mubr.msk.f32.mxu0 %vm4029_vm5, %v4012_v60 }
 0xfa1   :  { %4725 = vmatmul.mubr.msk.f32.vlgmr.msra.gmra.mxu0 %vm4029_vm5, %v4013_v62 }
0x1061   :  { %v4726_v2 = vpop.f32.mrf.mxu0 }
0x1062   :  { %v4108_v3 = vadd.f32 %v4726_v2, %v4260_v63 }
0x1063   :  { %v4102_v4 = vpop.f32.mrf.mxu0 }
0x1064   :  { %v4112_v5 = vadd.f32 %v4108_v3, %v5780_v17  ;;  %v4103_v6 = vadd.f32 %v4260_v63, %v4102_v4 }
0x1066   :  { %4114 = vst.msk [vmem:[#allocation19 + $0x8] sm:$0xff] %vm273_vm0, %v4112_v5  ;;  %v4111_v7 = vadd.f32 %v4103_v6, %v5783_v19 }
0x1068   :  { %4113 = vst.msk [vmem:[#allocation19] sm:$0xff] %vm273_vm0, %v4111_v7 }
0x1069   :  { %5064 = shalt.err (!%p5061_p12)
}
0x106a   :  { %4126 = dma.vmem_to_hbm [thread:$0]  %s4121_s6, 256, %s5295_s14, [#allocation4], %s5119_s0, %s5119_s0, %s5120_s26  }
0x106b   :  { %5085 = dma.done.wait [#allocation4], 256  }
0x106c   :  { %5086 = vsyncadd [#allocation4], 4294967040 }
0x106d   :  { %4130 = vsyncpa [#allocation3], 1 }
0x106e   :  { %4131 = vsyncpa [#allocation6], 1 }
0x106f   :  { %4132 = vsyncpa [#allocation9], 1 }
0x1070   :  { %4133 = vsyncpa [#allocation12], 1 }
0x1071   :  { %4134 = vsyncpa [#allocation15], 1 }
0x1072   :  { %4135 = vsyncpa [#allocation18], 1 }
0x1073   :  { %4136 = vsyncpa [#allocation4], 1 }

</bundles_post_ra>
